<compile_context>
chip_gen: v7x
topology: tpu7x:2x2x1
jax: 0.10.0
libtpu: 0.0.40
codegen_flags: <defaults>
</compile_context>

<pallas_src>
import functools
import math

import jax
import jax.numpy as jnp
import numpy as np
from jax.experimental import pallas as pl
from jax.experimental.pallas import tpu as pltpu


def _gmha_kernel(q_ref, kf_ref, vf_ref, gp_ref, wq_ref, wfc_ref,
                 gamma_ref, beta_ref, out_ref, *rest,
                 n_head, d_k, eps, return_attn):
    if return_attn:
        attn_ref, o_scr = rest
    else:
        (o_scr,) = rest

    residual = q_ref[...].astype(jnp.float32)                 # (tq, D)

    # Q projection: bf16 operands, f32 accumulate.  1/sqrt(d_k) is folded into
    # Wq in the wrapper.  K/V projections are hoisted out of the kernel and
    # arrive pre-projected as bf16 (Lk, D) slabs.
    qf = jnp.dot(q_ref[...].astype(jnp.bfloat16), wq_ref[...],
                 preferred_element_type=jnp.float32)          # (tq, D) f32
    kf = kf_ref[...]                                          # (Lk, D) bf16
    vf = vf_ref[...]                                          # (Lk, D) bf16

    for h in range(n_head):                                   # static, small
        lo = h * d_k
        q_h = qf[:, lo:lo + d_k].astype(jnp.bfloat16)         # (tq, d_k)
        k_h = kf[:, lo:lo + d_k]                              # (Lk, d_k)
        v_h = vf[:, lo:lo + d_k]                              # (Lk, d_k)

        # scores = q_h @ k_h.T via transposed contraction (no materialized .T).
        s = jax.lax.dot_general(q_h, k_h, (((1,), (1,)), ((), ())),
                                preferred_element_type=jnp.float32)   # (tq, Lk)
        s = s - jnp.max(s, axis=-1, keepdims=True)
        e = jnp.exp(s)
        denom = jnp.sum(e, axis=-1, keepdims=True)
        attno = e * pl.reciprocal(denom, approx=True)          # softmax (EUP recip)

        if return_attn:
            # Lane-dense (last dim = Lk) per-head store, no jnp.stack copy.
            attn_ref[0, h] = attno.astype(attn_ref.dtype)

        a = (attno * gp_ref[h]).astype(jnp.bfloat16)           # (tq, Lk)
        o_h = jnp.dot(a, v_h, preferred_element_type=jnp.float32)   # (tq, d_k)
        o_scr[:, lo:lo + d_k] = o_h.astype(jnp.bfloat16)       # cheap vst slice

    # Single fused output projection (K = D) instead of n_head narrow-K matmuls.
    y = jnp.dot(o_scr[...], wfc_ref[...], preferred_element_type=jnp.float32)
    y = y + residual
    mean = jnp.mean(y, axis=-1, keepdims=True)
    var = jnp.mean((y - mean) ** 2, axis=-1, keepdims=True)    # biased, like torch LN
    y = (y - mean) * jax.lax.rsqrt(var + eps)
    out_ref[...] = (y * gamma_ref[...] + beta_ref[...]).astype(out_ref.dtype)


def _pick_vmem_limit(need_bytes):
    """Per-generation VMEM limit: computed from block footprint, capped below phys."""
    kind = jax.devices()[0].device_kind.lower()
    phys = 64 * 2**20 if ("v7" in kind or "7x" in kind) else 128 * 2**20
    cap = (3 * phys) // 4                         # headroom for compiler scratch
    return int(min(max(need_bytes * 5 // 4, 16 * 2**20), cap))


def graph_multihead_attention(q, k, v, graph_pos, params, *, n_head,
                              q_tile=None, return_attn=True,
                              attn_dtype=jnp.float32, eps=1e-6):
    """q, k, v: (L, B, d_model); graph_pos: (len_k, len_q, n_head).

    Returns (out, attn) with out: (L, B, d_model), attn: (B, H, Lq, Lk)
    (or just out when return_attn=False), matching the PyTorch module in eval
    mode.  Pass attn_dtype=jnp.bfloat16 (and/or bf16 graph_pos) when the caller
    tolerates it: the return_attn path is HBM-bandwidth-bound.
    """
    L, B, D = q.shape
    assert k.shape == (L, B, D) and v.shape == (L, B, D)
    assert D % n_head == 0
    d_k = D // n_head
    Lq = Lk = L

    if q_tile is None:
        if Lq % 256 == 0:
            q_tile = 256            # fills the 256-row MXU on v6e/v7x
        elif Lq % 128 == 0:
            q_tile = 128
        else:
            q_tile = Lq
    assert Lq % q_tile == 0
    if q_tile != Lq:
        assert q_tile % 8 == 0, "q_tile must be a multiple of 8 (sublane)"
    nq = Lq // q_tile

    # (L, B, D) -> (L, B*D) is a free reshape; each batch's (tile, D) slab is
    # DMA'd directly via the BlockSpec index_map.
    assert B == 1 or D % 128 == 0, (
        "d_model must be a multiple of 128 for the strided batch layout")

    bf16 = jnp.bfloat16
    inv_temp = 1.0 / (d_k ** 0.5)
    wq_t = (params["w_qs"].T * inv_temp).astype(bf16)    # temp folded into Wq
    wk_t = params["w_ks"].T.astype(bf16)
    wv_t = params["w_vs"].T.astype(bf16)
    wfc_t = params["fc"].T.astype(bf16)
    gamma = params["ln_gamma"].reshape(1, D).astype(jnp.float32)
    beta = params["ln_beta"].reshape(1, D).astype(jnp.float32)

    q2 = q.reshape(Lq, B * D)
    # K/V projections hoisted out of the q-tile loop: computed ONCE per batch
    # position in XLA (bf16 MXU, f32 accumulate), stored bf16 -> half the DMA.
    kf2 = jnp.dot(k.reshape(Lk * B, D).astype(bf16), wk_t,
                  preferred_element_type=jnp.float32).astype(bf16).reshape(Lk, B * D)
    vf2 = jnp.dot(v.reshape(Lk * B, D).astype(bf16), wv_t,
                  preferred_element_type=jnp.float32).astype(bf16).reshape(Lk, B * D)
    gp = jnp.transpose(graph_pos, (2, 1, 0))             # (H, Lq, Lk), one-time

    kernel = functools.partial(_gmha_kernel, n_head=n_head, d_k=d_k,
                               eps=eps, return_attn=return_attn)

    out_dtype = q.dtype
    out_spec = pl.BlockSpec((q_tile, D), lambda b, i: (i, b))
    if return_attn:
        out_shape = (jax.ShapeDtypeStruct((Lq, B * D), out_dtype),
                     jax.ShapeDtypeStruct((B, n_head, Lq, Lk), attn_dtype))
        out_specs = (out_spec,
                     pl.BlockSpec((1, n_head, q_tile, Lk),
                                  lambda b, i: (b, 0, i, 0)))
    else:
        out_shape = jax.ShapeDtypeStruct((Lq, B * D), out_dtype)
        out_specs = out_spec

    itm = lambda dt: jnp.dtype(dt).itemsize
    need = (2 * q_tile * D * itm(q.dtype)                 # q block (double-buffered)
            + 2 * 2 * Lk * D * 2                          # kf, vf (bf16)
            + 2 * n_head * q_tile * Lk * itm(gp.dtype)    # graph_pos block
            + 2 * 2 * D * D * 2                           # Wq, Wfc (bf16)
            + 2 * 2 * D * 4                               # gamma, beta
            + 2 * q_tile * D * itm(out_dtype)             # out block
            + (2 * n_head * q_tile * Lk * itm(attn_dtype) if return_attn else 0)
            + q_tile * D * 2)                             # o_scr scratch

    result = pl.pallas_call(
        kernel,
        out_shape=out_shape,
        grid_spec=pltpu.PrefetchScalarGridSpec(
            num_scalar_prefetch=0,
            grid=(B, nq),   # keep B*nq >= 2 in production for v7x's 2 TCs
            in_specs=[
                pl.BlockSpec((q_tile, D), lambda b, i: (i, b)),              # q slab
                pl.BlockSpec((Lk, D), lambda b, i: (0, b)),                  # kf (bf16)
                pl.BlockSpec((Lk, D), lambda b, i: (0, b)),                  # vf (bf16)
                pl.BlockSpec((n_head, q_tile, Lk), lambda b, i: (0, i, 0)),  # graph_pos
                pl.BlockSpec((D, D), lambda b, i: (0, 0)),                   # Wq^T/temp
                pl.BlockSpec((D, D), lambda b, i: (0, 0)),                   # Wfc^T
                pl.BlockSpec((1, D), lambda b, i: (0, 0)),                   # ln gamma
                pl.BlockSpec((1, D), lambda b, i: (0, 0)),                   # ln beta
            ],
            out_specs=out_specs,
            scratch_shapes=[pltpu.VMEM((q_tile, D), jnp.bfloat16)],          # head concat
        ),
        compiler_params=pltpu.CompilerParams(
            dimension_semantics=("parallel", "parallel"),
            vmem_limit_bytes=_pick_vmem_limit(need),
        ),
    )(q2, kf2, vf2, gp, wq_t, wfc_t, gamma, beta)

    if return_attn:
        out2, attn = result
        return out2.reshape(Lq, B, D), attn
    return result.reshape(Lq, B, D)


def _reference(q, k, v, graph_pos, params, *, n_head, eps=1e-6):
    """Pure-JAX (f32) reference mirroring the PyTorch forward (eval mode)."""
    L, B, D = q.shape
    d_k = D // n_head
    qb = jnp.transpose(q, (1, 0, 2))
    kb = jnp.transpose(k, (1, 0, 2))
    vb = jnp.transpose(v, (1, 0, 2))
    residual = qb
    Q = (qb @ params["w_qs"].T).reshape(B, L, n_head, d_k).transpose(0, 2, 1, 3)
    K = (kb @ params["w_ks"].T).reshape(B, L, n_head, d_k).transpose(0, 2, 1, 3)
    V = (vb @ params["w_vs"].T).reshape(B, L, n_head, d_k).transpose(0, 2, 1, 3)
    scores = (Q / (d_k ** 0.5)) @ jnp.swapaxes(K, 2, 3)
    attno = jax.nn.softmax(scores, axis=-1)
    gp = jnp.transpose(graph_pos, (2, 1, 0))[None]
    out = (attno * gp) @ V
    out = out.transpose(0, 2, 1, 3).reshape(B, L, D)
    y = out @ params["fc"].T + residual
    mean = y.mean(-1, keepdims=True)
    var = ((y - mean) ** 2).mean(-1, keepdims=True)
    y = (y - mean) / jnp.sqrt(var + eps)
    y = y * params["ln_gamma"] + params["ln_beta"]
    return jnp.transpose(y, (1, 0, 2)), attno


if __name__ == "__main__":
    # Small lane-dense shapes: seq=128, batch=2, d_model=128, n_head=4 (d_k=32).
    L, B, D, H = 128, 2, 128, 4
    key = jax.random.PRNGKey(0)
    ks = jax.random.split(key, 8)

    q = jax.random.normal(ks[0], (L, B, D), jnp.float32)
    k = jax.random.normal(ks[1], (L, B, D), jnp.float32)
    v = jax.random.normal(ks[2], (L, B, D), jnp.float32)
    graph_pos = jax.random.uniform(ks[3], (L, L, H), jnp.float32)

    bound = 1.0 / math.sqrt(D)
    params = {
        "w_qs": jax.random.uniform(ks[4], (D, D), jnp.float32, -bound, bound),
        "w_ks": jax.random.uniform(ks[5], (D, D), jnp.float32, -bound, bound),
        "w_vs": jax.random.uniform(ks[6], (D, D), jnp.float32, -bound, bound),
        "fc":   jax.random.uniform(ks[7], (D, D), jnp.float32, -bound, bound),
        "ln_gamma": jnp.ones((D,), jnp.float32),
        "ln_beta":  jnp.zeros((D,), jnp.float32),
    }

    # q_tile=64 exercises the multi-q-tile path (grid = (B, 2)).
    out, attn = graph_multihead_attention(q, k, v, graph_pos, params,
                                          n_head=H, q_tile=64, return_attn=True)
    out = jax.block_until_ready(out)
    attn = jax.block_until_ready(attn)

    ref_out, ref_attn = _reference(q, k, v, graph_pos, params, n_head=H)
    # bf16 matmul operands (f32 accumulate) => relaxed tolerances vs the f32 ref.
    np.testing.assert_allclose(np.asarray(out), np.asarray(ref_out),
                               rtol=3e-2, atol=3e-2)
    np.testing.assert_allclose(np.asarray(attn), np.asarray(ref_attn),
                               rtol=3e-2, atol=2e-2)

    # Fast path: default q_tile, skip the O(L^2) attention-weights writeback.
    out_only = graph_multihead_attention(q, k, v, graph_pos, params,
                                         n_head=H, return_attn=False)
    out_only = jax.block_until_ready(out_only)
    np.testing.assert_allclose(np.asarray(out_only), np.asarray(ref_out),
                               rtol=3e-2, atol=3e-2)

    assert out.shape == (L, B, D) and attn.shape == (B, H, L, L)
    print("KERNEL_OK")
</pallas_src>

<mosaic_0001>
module attributes {stable_mosaic.version = 11 : i64} {
  func.func @_gmha_kernel(%arg0: i32, %arg1: i32, %arg2: memref<64x128xf32, #tpu.memory_space<vmem>>, %arg3: memref<128x128xbf16, #tpu.memory_space<vmem>>, %arg4: memref<128x128xbf16, #tpu.memory_space<vmem>>, %arg5: memref<4x64x128xf32, #tpu.memory_space<vmem>>, %arg6: memref<128x128xbf16, #tpu.memory_space<vmem>>, %arg7: memref<128x128xbf16, #tpu.memory_space<vmem>>, %arg8: memref<1x128xf32, #tpu.memory_space<vmem>>, %arg9: memref<1x128xf32, #tpu.memory_space<vmem>>, %arg10: memref<64x128xf32, #tpu.memory_space<vmem>>, %arg11: memref<1x4x64x128xf32, #tpu.memory_space<vmem>>, %arg12: memref<64x128xbf16, #tpu.memory_space<vmem>>) attributes {dimension_semantics = [#tpu.dimension_semantics<parallel>, #tpu.dimension_semantics<parallel>], iteration_bounds = array<i64: 2, 2>, scalar_prefetch = 0 : i64, scratch_operands = 1 : i64, tpu.core_type = #tpu.core_type<tc>, window_params = [{transform_indices = @transform_0, window_bounds = array<i64: 64, 128>}, {transform_indices = @transform_1, window_bounds = array<i64: 128, 128>}, {transform_indices = @transform_2, window_bounds = array<i64: 128, 128>}, {transform_indices = @transform_3, window_bounds = array<i64: 4, 64, 128>}, {pipeline_mode = #tpu.pipeline_mode<synchronous>, transform_indices = @transform_4, window_bounds = array<i64: 128, 128>}, {pipeline_mode = #tpu.pipeline_mode<synchronous>, transform_indices = @transform_5, window_bounds = array<i64: 128, 128>}, {pipeline_mode = #tpu.pipeline_mode<synchronous>, transform_indices = @transform_6, window_bounds = array<i64: 1, 128>}, {pipeline_mode = #tpu.pipeline_mode<synchronous>, transform_indices = @transform_7, window_bounds = array<i64: 1, 128>}, {transform_indices = @transform_8, window_bounds = array<i64: 64, 128>}, {transform_indices = @transform_9, window_bounds = array<i64: 1, 4, 64, 128>}]} {
    %c0 = arith.constant 0 : index
    %c0_0 = arith.constant 0 : index
    %0 = vector.load %arg2[%c0, %c0_0] : memref<64x128xf32, #tpu.memory_space<vmem>>, vector<64x128xf32>
    %c0_1 = arith.constant 0 : index
    %c0_2 = arith.constant 0 : index
    %1 = vector.load %arg2[%c0_1, %c0_2] : memref<64x128xf32, #tpu.memory_space<vmem>>, vector<64x128xf32>
    %2 = arith.truncf %1 : vector<64x128xf32> to vector<64x128xbf16>
    %c0_3 = arith.constant 0 : index
    %c0_4 = arith.constant 0 : index
    %3 = vector.load %arg6[%c0_3, %c0_4] : memref<128x128xbf16, #tpu.memory_space<vmem>>, vector<128x128xbf16>
    %cst = arith.constant dense<0.000000e+00> : vector<64x128xf32>
    %4 = tpu.matmul %2, %3, %cst {dimension_numbers = #tpu.dot_dimension_numbers<[1], [0], [0], [1], [0, 0, 1, 1], [], []>} : vector<64x128xbf16>, vector<128x128xbf16>, vector<64x128xf32> -> vector<64x128xf32>
    %c0_5 = arith.constant 0 : index
    %c0_6 = arith.constant 0 : index
    %5 = vector.load %arg3[%c0_5, %c0_6] : memref<128x128xbf16, #tpu.memory_space<vmem>>, vector<128x128xbf16>
    %c0_7 = arith.constant 0 : index
    %c0_8 = arith.constant 0 : index
    %6 = vector.load %arg4[%c0_7, %c0_8] : memref<128x128xbf16, #tpu.memory_space<vmem>>, vector<128x128xbf16>
    %7 = vector.extract_strided_slice %4 {offsets = [0, 0], sizes = [64, 32], strides = [1, 1]} : vector<64x128xf32> to vector<64x32xf32>
    %8 = arith.truncf %7 : vector<64x32xf32> to vector<64x32xbf16>
    %9 = vector.extract_strided_slice %5 {offsets = [0, 0], sizes = [128, 32], strides = [1, 1]} : vector<128x128xbf16> to vector<128x32xbf16>
    %10 = vector.extract_strided_slice %6 {offsets = [0, 0], sizes = [128, 32], strides = [1, 1]} : vector<128x128xbf16> to vector<128x32xbf16>
    %cst_9 = arith.constant dense<0.000000e+00> : vector<64x128xf32>
    %11 = tpu.matmul %8, %9, %cst_9 {dimension_numbers = #tpu.dot_dimension_numbers<[1], [1], [0], [0], [0, 0, 1, 0], [], []>} : vector<64x32xbf16>, vector<128x32xbf16>, vector<64x128xf32> -> vector<64x128xf32>
    %cst_10 = arith.constant dense<0xFF800000> : vector<64xf32>
    %12 = vector.multi_reduction <maximumf>, %11, %cst_10 [1] : vector<64x128xf32> to vector<64xf32>
    %13 = vector.shape_cast %12 : vector<64xf32> to vector<64x1xf32>
    %14 = vector.broadcast %13 : vector<64x1xf32> to vector<64x128xf32>
    %15 = arith.subf %11, %14 : vector<64x128xf32>
    %16 = math.exp %15 : vector<64x128xf32>
    %cst_11 = arith.constant dense<0.000000e+00> : vector<64xf32>
    %17 = vector.multi_reduction <add>, %16, %cst_11 [1] : vector<64x128xf32> to vector<64xf32>
    %18 = vector.shape_cast %17 : vector<64xf32> to vector<64x1xf32>
    %19 = tpu.reciprocal %18 {approx = true} : vector<64x1xf32> -> vector<64x1xf32>
    %20 = vector.broadcast %19 : vector<64x1xf32> to vector<64x128xf32>
    %21 = arith.mulf %16, %20 : vector<64x128xf32>
    %c0_12 = arith.constant 0 : index
    %c0_13 = arith.constant 0 : index
    %c0_14 = arith.constant 0 : index
    %c0_15 = arith.constant 0 : index
    %22 = vector.load %arg11[%c0_12, %c0_13, %c0_14, %c0_15] : memref<1x4x64x128xf32, #tpu.memory_space<vmem>>, vector<1x1x64x128xf32>
    %23 = vector.shape_cast %22 : vector<1x1x64x128xf32> to vector<64x128xf32>
    %24 = vector.shape_cast %21 : vector<64x128xf32> to vector<1x1x64x128xf32>
    tpu.vector_store %arg11[%c0_12, %c0_13, %c0_14, %c0_15], %24 {strides = array<i32>} : memref<1x4x64x128xf32, #tpu.memory_space<vmem>>, vector<1x1x64x128xf32>,
    %c0_16 = arith.constant 0 : index
    %c0_17 = arith.constant 0 : index
    %c0_18 = arith.constant 0 : index
    %25 = vector.load %arg5[%c0_16, %c0_17, %c0_18] : memref<4x64x128xf32, #tpu.memory_space<vmem>>, vector<1x64x128xf32>
    %26 = vector.shape_cast %25 : vector<1x64x128xf32> to vector<64x128xf32>
    %27 = arith.mulf %21, %26 : vector<64x128xf32>
    %28 = arith.truncf %27 : vector<64x128xf32> to vector<64x128xbf16>
    %cst_19 = arith.constant dense<0.000000e+00> : vector<64x32xf32>
    %29 = tpu.matmul %28, %10, %cst_19 {dimension_numbers = #tpu.dot_dimension_numbers<[1], [0], [0], [1], [0, 0, 1, 1], [], []>} : vector<64x128xbf16>, vector<128x32xbf16>, vector<64x32xf32> -> vector<64x32xf32>
    %30 = arith.truncf %29 : vector<64x32xf32> to vector<64x32xbf16>
    %c0_20 = arith.constant 0 : index
    %c0_21 = arith.constant 0 : index
    %31 = vector.load %arg12[%c0_20, %c0_21] : memref<64x128xbf16, #tpu.memory_space<vmem>>, vector<64x32xbf16>
    tpu.vector_store %arg12[%c0_20, %c0_21], %30 {strides = array<i32>} : memref<64x128xbf16, #tpu.memory_space<vmem>>, vector<64x32xbf16>,
    %32 = vector.extract_strided_slice %4 {offsets = [0, 32], sizes = [64, 32], strides = [1, 1]} : vector<64x128xf32> to vector<64x32xf32>
    %33 = arith.truncf %32 : vector<64x32xf32> to vector<64x32xbf16>
    %34 = vector.extract_strided_slice %5 {offsets = [0, 32], sizes = [128, 32], strides = [1, 1]} : vector<128x128xbf16> to vector<128x32xbf16>
    %35 = vector.extract_strided_slice %6 {offsets = [0, 32], sizes = [128, 32], strides = [1, 1]} : vector<128x128xbf16> to vector<128x32xbf16>
    %cst_22 = arith.constant dense<0.000000e+00> : vector<64x128xf32>
    %36 = tpu.matmul %33, %34, %cst_22 {dimension_numbers = #tpu.dot_dimension_numbers<[1], [1], [0], [0], [0, 0, 1, 0], [], []>} : vector<64x32xbf16>, vector<128x32xbf16>, vector<64x128xf32> -> vector<64x128xf32>
    %cst_23 = arith.constant dense<0xFF800000> : vector<64xf32>
    %37 = vector.multi_reduction <maximumf>, %36, %cst_23 [1] : vector<64x128xf32> to vector<64xf32>
    %38 = vector.shape_cast %37 : vector<64xf32> to vector<64x1xf32>
    %39 = vector.broadcast %38 : vector<64x1xf32> to vector<64x128xf32>
    %40 = arith.subf %36, %39 : vector<64x128xf32>
    %41 = math.exp %40 : vector<64x128xf32>
    %cst_24 = arith.constant dense<0.000000e+00> : vector<64xf32>
    %42 = vector.multi_reduction <add>, %41, %cst_24 [1] : vector<64x128xf32> to vector<64xf32>
    %43 = vector.shape_cast %42 : vector<64xf32> to vector<64x1xf32>
    %44 = tpu.reciprocal %43 {approx = true} : vector<64x1xf32> -> vector<64x1xf32>
    %45 = vector.broadcast %44 : vector<64x1xf32> to vector<64x128xf32>
    %46 = arith.mulf %41, %45 : vector<64x128xf32>
    %c0_25 = arith.constant 0 : index
    %c1 = arith.constant 1 : index
    %c0_26 = arith.constant 0 : index
    %c0_27 = arith.constant 0 : index
    %47 = vector.load %arg11[%c0_25, %c1, %c0_26, %c0_27] : memref<1x4x64x128xf32, #tpu.memory_space<vmem>>, vector<1x1x64x128xf32>
    %48 = vector.shape_cast %47 : vector<1x1x64x128xf32> to vector<64x128xf32>
    %49 = vector.shape_cast %46 : vector<64x128xf32> to vector<1x1x64x128xf32>
    tpu.vector_store %arg11[%c0_25, %c1, %c0_26, %c0_27], %49 {strides = array<i32>} : memref<1x4x64x128xf32, #tpu.memory_space<vmem>>, vector<1x1x64x128xf32>,
    %c1_28 = arith.constant 1 : index
    %c0_29 = arith.constant 0 : index
    %c0_30 = arith.constant 0 : index
    %50 = vector.load %arg5[%c1_28, %c0_29, %c0_30] : memref<4x64x128xf32, #tpu.memory_space<vmem>>, vector<1x64x128xf32>
    %51 = vector.shape_cast %50 : vector<1x64x128xf32> to vector<64x128xf32>
    %52 = arith.mulf %46, %51 : vector<64x128xf32>
    %53 = arith.truncf %52 : vector<64x128xf32> to vector<64x128xbf16>
    %cst_31 = arith.constant dense<0.000000e+00> : vector<64x32xf32>
    %54 = tpu.matmul %53, %35, %cst_31 {dimension_numbers = #tpu.dot_dimension_numbers<[1], [0], [0], [1], [0, 0, 1, 1], [], []>} : vector<64x128xbf16>, vector<128x32xbf16>, vector<64x32xf32> -> vector<64x32xf32>
    %55 = arith.truncf %54 : vector<64x32xf32> to vector<64x32xbf16>
    %c0_32 = arith.constant 0 : index
    %c32 = arith.constant 32 : index
    %56 = vector.load %arg12[%c0_32, %c32] : memref<64x128xbf16, #tpu.memory_space<vmem>>, vector<64x32xbf16>
    tpu.vector_store %arg12[%c0_32, %c32], %55 {strides = array<i32>} : memref<64x128xbf16, #tpu.memory_space<vmem>>, vector<64x32xbf16>,
    %57 = vector.extract_strided_slice %4 {offsets = [0, 64], sizes = [64, 32], strides = [1, 1]} : vector<64x128xf32> to vector<64x32xf32>
    %58 = arith.truncf %57 : vector<64x32xf32> to vector<64x32xbf16>
    %59 = vector.extract_strided_slice %5 {offsets = [0, 64], sizes = [128, 32], strides = [1, 1]} : vector<128x128xbf16> to vector<128x32xbf16>
    %60 = vector.extract_strided_slice %6 {offsets = [0, 64], sizes = [128, 32], strides = [1, 1]} : vector<128x128xbf16> to vector<128x32xbf16>
    %cst_33 = arith.constant dense<0.000000e+00> : vector<64x128xf32>
    %61 = tpu.matmul %58, %59, %cst_33 {dimension_numbers = #tpu.dot_dimension_numbers<[1], [1], [0], [0], [0, 0, 1, 0], [], []>} : vector<64x32xbf16>, vector<128x32xbf16>, vector<64x128xf32> -> vector<64x128xf32>
    %cst_34 = arith.constant dense<0xFF800000> : vector<64xf32>
    %62 = vector.multi_reduction <maximumf>, %61, %cst_34 [1] : vector<64x128xf32> to vector<64xf32>
    %63 = vector.shape_cast %62 : vector<64xf32> to vector<64x1xf32>
    %64 = vector.broadcast %63 : vector<64x1xf32> to vector<64x128xf32>
    %65 = arith.subf %61, %64 : vector<64x128xf32>
    %66 = math.exp %65 : vector<64x128xf32>
    %cst_35 = arith.constant dense<0.000000e+00> : vector<64xf32>
    %67 = vector.multi_reduction <add>, %66, %cst_35 [1] : vector<64x128xf32> to vector<64xf32>
    %68 = vector.shape_cast %67 : vector<64xf32> to vector<64x1xf32>
    %69 = tpu.reciprocal %68 {approx = true} : vector<64x1xf32> -> vector<64x1xf32>
    %70 = vector.broadcast %69 : vector<64x1xf32> to vector<64x128xf32>
    %71 = arith.mulf %66, %70 : vector<64x128xf32>
    %c0_36 = arith.constant 0 : index
    %c2 = arith.constant 2 : index
    %c0_37 = arith.constant 0 : index
    %c0_38 = arith.constant 0 : index
    %72 = vector.load %arg11[%c0_36, %c2, %c0_37, %c0_38] : memref<1x4x64x128xf32, #tpu.memory_space<vmem>>, vector<1x1x64x128xf32>
    %73 = vector.shape_cast %72 : vector<1x1x64x128xf32> to vector<64x128xf32>
    %74 = vector.shape_cast %71 : vector<64x128xf32> to vector<1x1x64x128xf32>
    tpu.vector_store %arg11[%c0_36, %c2, %c0_37, %c0_38], %74 {strides = array<i32>} : memref<1x4x64x128xf32, #tpu.memory_space<vmem>>, vector<1x1x64x128xf32>,
    %c2_39 = arith.constant 2 : index
    %c0_40 = arith.constant 0 : index
    %c0_41 = arith.constant 0 : index
    %75 = vector.load %arg5[%c2_39, %c0_40, %c0_41] : memref<4x64x128xf32, #tpu.memory_space<vmem>>, vector<1x64x128xf32>
    %76 = vector.shape_cast %75 : vector<1x64x128xf32> to vector<64x128xf32>
    %77 = arith.mulf %71, %76 : vector<64x128xf32>
    %78 = arith.truncf %77 : vector<64x128xf32> to vector<64x128xbf16>
    %cst_42 = arith.constant dense<0.000000e+00> : vector<64x32xf32>
    %79 = tpu.matmul %78, %60, %cst_42 {dimension_numbers = #tpu.dot_dimension_numbers<[1], [0], [0], [1], [0, 0, 1, 1], [], []>} : vector<64x128xbf16>, vector<128x32xbf16>, vector<64x32xf32> -> vector<64x32xf32>
    %80 = arith.truncf %79 : vector<64x32xf32> to vector<64x32xbf16>
    %c0_43 = arith.constant 0 : index
    %c64 = arith.constant 64 : index
    %81 = vector.load %arg12[%c0_43, %c64] : memref<64x128xbf16, #tpu.memory_space<vmem>>, vector<64x32xbf16>
    tpu.vector_store %arg12[%c0_43, %c64], %80 {strides = array<i32>} : memref<64x128xbf16, #tpu.memory_space<vmem>>, vector<64x32xbf16>,
    %82 = vector.extract_strided_slice %4 {offsets = [0, 96], sizes = [64, 32], strides = [1, 1]} : vector<64x128xf32> to vector<64x32xf32>
    %83 = arith.truncf %82 : vector<64x32xf32> to vector<64x32xbf16>
    %84 = vector.extract_strided_slice %5 {offsets = [0, 96], sizes = [128, 32], strides = [1, 1]} : vector<128x128xbf16> to vector<128x32xbf16>
    %85 = vector.extract_strided_slice %6 {offsets = [0, 96], sizes = [128, 32], strides = [1, 1]} : vector<128x128xbf16> to vector<128x32xbf16>
    %cst_44 = arith.constant dense<0.000000e+00> : vector<64x128xf32>
    %86 = tpu.matmul %83, %84, %cst_44 {dimension_numbers = #tpu.dot_dimension_numbers<[1], [1], [0], [0], [0, 0, 1, 0], [], []>} : vector<64x32xbf16>, vector<128x32xbf16>, vector<64x128xf32> -> vector<64x128xf32>
    %cst_45 = arith.constant dense<0xFF800000> : vector<64xf32>
    %87 = vector.multi_reduction <maximumf>, %86, %cst_45 [1] : vector<64x128xf32> to vector<64xf32>
    %88 = vector.shape_cast %87 : vector<64xf32> to vector<64x1xf32>
    %89 = vector.broadcast %88 : vector<64x1xf32> to vector<64x128xf32>
    %90 = arith.subf %86, %89 : vector<64x128xf32>
    %91 = math.exp %90 : vector<64x128xf32>
    %cst_46 = arith.constant dense<0.000000e+00> : vector<64xf32>
    %92 = vector.multi_reduction <add>, %91, %cst_46 [1] : vector<64x128xf32> to vector<64xf32>
    %93 = vector.shape_cast %92 : vector<64xf32> to vector<64x1xf32>
    %94 = tpu.reciprocal %93 {approx = true} : vector<64x1xf32> -> vector<64x1xf32>
    %95 = vector.broadcast %94 : vector<64x1xf32> to vector<64x128xf32>
    %96 = arith.mulf %91, %95 : vector<64x128xf32>
    %c0_47 = arith.constant 0 : index
    %c3 = arith.constant 3 : index
    %c0_48 = arith.constant 0 : index
    %c0_49 = arith.constant 0 : index
    %97 = vector.load %arg11[%c0_47, %c3, %c0_48, %c0_49] : memref<1x4x64x128xf32, #tpu.memory_space<vmem>>, vector<1x1x64x128xf32>
    %98 = vector.shape_cast %97 : vector<1x1x64x128xf32> to vector<64x128xf32>
    %99 = vector.shape_cast %96 : vector<64x128xf32> to vector<1x1x64x128xf32>
    tpu.vector_store %arg11[%c0_47, %c3, %c0_48, %c0_49], %99 {strides = array<i32>} : memref<1x4x64x128xf32, #tpu.memory_space<vmem>>, vector<1x1x64x128xf32>,
    %c3_50 = arith.constant 3 : index
    %c0_51 = arith.constant 0 : index
    %c0_52 = arith.constant 0 : index
    %100 = vector.load %arg5[%c3_50, %c0_51, %c0_52] : memref<4x64x128xf32, #tpu.memory_space<vmem>>, vector<1x64x128xf32>
    %101 = vector.shape_cast %100 : vector<1x64x128xf32> to vector<64x128xf32>
    %102 = arith.mulf %96, %101 : vector<64x128xf32>
    %103 = arith.truncf %102 : vector<64x128xf32> to vector<64x128xbf16>
    %cst_53 = arith.constant dense<0.000000e+00> : vector<64x32xf32>
    %104 = tpu.matmul %103, %85, %cst_53 {dimension_numbers = #tpu.dot_dimension_numbers<[1], [0], [0], [1], [0, 0, 1, 1], [], []>} : vector<64x128xbf16>, vector<128x32xbf16>, vector<64x32xf32> -> vector<64x32xf32>
    %105 = arith.truncf %104 : vector<64x32xf32> to vector<64x32xbf16>
    %c0_54 = arith.constant 0 : index
    %c96 = arith.constant 96 : index
    %106 = vector.load %arg12[%c0_54, %c96] : memref<64x128xbf16, #tpu.memory_space<vmem>>, vector<64x32xbf16>
    tpu.vector_store %arg12[%c0_54, %c96], %105 {strides = array<i32>} : memref<64x128xbf16, #tpu.memory_space<vmem>>, vector<64x32xbf16>,
    %c0_55 = arith.constant 0 : index
    %c0_56 = arith.constant 0 : index
    %107 = vector.load %arg12[%c0_55, %c0_56] : memref<64x128xbf16, #tpu.memory_space<vmem>>, vector<64x128xbf16>
    %c0_57 = arith.constant 0 : index
    %c0_58 = arith.constant 0 : index
    %108 = vector.load %arg7[%c0_57, %c0_58] : memref<128x128xbf16, #tpu.memory_space<vmem>>, vector<128x128xbf16>
    %cst_59 = arith.constant dense<0.000000e+00> : vector<64x128xf32>
    %109 = tpu.matmul %107, %108, %cst_59 {dimension_numbers = #tpu.dot_dimension_numbers<[1], [0], [0], [1], [0, 0, 1, 1], [], []>} : vector<64x128xbf16>, vector<128x128xbf16>, vector<64x128xf32> -> vector<64x128xf32>
    %110 = arith.addf %109, %0 : vector<64x128xf32>
    %cst_60 = arith.constant dense<0.000000e+00> : vector<64xf32>
    %111 = vector.multi_reduction <add>, %110, %cst_60 [1] : vector<64x128xf32> to vector<64xf32>
    %112 = vector.shape_cast %111 : vector<64xf32> to vector<64x1xf32>
    %cst_61 = arith.constant 1.280000e+02 : f32
    %113 = vector.broadcast %cst_61 : f32 to vector<64x1xf32>
    %114 = arith.divf %112, %113 : vector<64x1xf32>
    %115 = vector.broadcast %114 : vector<64x1xf32> to vector<64x128xf32>
    %116 = arith.subf %110, %115 : vector<64x128xf32>
    %117 = arith.mulf %116, %116 : vector<64x128xf32>
    %cst_62 = arith.constant dense<0.000000e+00> : vector<64xf32>
    %118 = vector.multi_reduction <add>, %117, %cst_62 [1] : vector<64x128xf32> to vector<64xf32>
    %119 = vector.shape_cast %118 : vector<64xf32> to vector<64x1xf32>
    %cst_63 = arith.constant 1.280000e+02 : f32
    %120 = vector.broadcast %cst_63 : f32 to vector<64x1xf32>
    %121 = arith.divf %119, %120 : vector<64x1xf32>
    %122 = vector.broadcast %114 : vector<64x1xf32> to vector<64x128xf32>
    %123 = arith.subf %110, %122 : vector<64x128xf32>
    %cst_64 = arith.constant 9.99999997E-7 : f32
    %124 = vector.broadcast %cst_64 : f32 to vector<64x1xf32>
    %125 = arith.addf %121, %124 : vector<64x1xf32>
    %126 = math.rsqrt %125 : vector<64x1xf32>
    %127 = vector.broadcast %126 : vector<64x1xf32> to vector<64x128xf32>
    %128 = arith.mulf %123, %127 : vector<64x128xf32>
    %c0_65 = arith.constant 0 : index
    %c0_66 = arith.constant 0 : index
    %129 = vector.load %arg8[%c0_65, %c0_66] : memref<1x128xf32, #tpu.memory_space<vmem>>, vector<1x128xf32>
    %130 = vector.broadcast %129 : vector<1x128xf32> to vector<64x128xf32>
    %131 = arith.mulf %128, %130 : vector<64x128xf32>
    %c0_67 = arith.constant 0 : index
    %c0_68 = arith.constant 0 : index
    %132 = vector.load %arg9[%c0_67, %c0_68] : memref<1x128xf32, #tpu.memory_space<vmem>>, vector<1x128xf32>
    %133 = vector.broadcast %132 : vector<1x128xf32> to vector<64x128xf32>
    %134 = arith.addf %131, %133 : vector<64x128xf32>
    %c0_69 = arith.constant 0 : index
    %c0_70 = arith.constant 0 : index
    %135 = vector.load %arg10[%c0_69, %c0_70] : memref<64x128xf32, #tpu.memory_space<vmem>>, vector<64x128xf32>
    tpu.vector_store %arg10[%c0_69, %c0_70], %134 {strides = array<i32>} : memref<64x128xf32, #tpu.memory_space<vmem>>, vector<64x128xf32>,
    return
  }
  func.func @transform_0(%arg0: i32, %arg1: i32) -> (i32, i32) {
    %c0_i32 = arith.constant 0 : i32
    return %arg1, %arg0 : i32, i32
  }
  func.func @transform_1(%arg0: i32, %arg1: i32) -> (i32, i32) {
    %c0_i32 = arith.constant 0 : i32
    %c0_i32_0 = arith.constant 0 : i32
    return %c0_i32, %arg0 : i32, i32
  }
  func.func @transform_2(%arg0: i32, %arg1: i32) -> (i32, i32) {
    %c0_i32 = arith.constant 0 : i32
    %c0_i32_0 = arith.constant 0 : i32
    return %c0_i32, %arg0 : i32, i32
  }
  func.func @transform_3(%arg0: i32, %arg1: i32) -> (i32, i32, i32) {
    %c0_i32 = arith.constant 0 : i32
    %c0_i32_0 = arith.constant 0 : i32
    %c0_i32_1 = arith.constant 0 : i32
    return %c0_i32, %arg1, %c0_i32_0 : i32, i32, i32
  }
  func.func @transform_4(%arg0: i32, %arg1: i32) -> (i32, i32) {
    %c0_i32 = arith.constant 0 : i32
    %c0_i32_0 = arith.constant 0 : i32
    %c0_i32_1 = arith.constant 0 : i32
    return %c0_i32, %c0_i32_0 : i32, i32
  }
  func.func @transform_5(%arg0: i32, %arg1: i32) -> (i32, i32) {
    %c0_i32 = arith.constant 0 : i32
    %c0_i32_0 = arith.constant 0 : i32
    %c0_i32_1 = arith.constant 0 : i32
    return %c0_i32, %c0_i32_0 : i32, i32
  }
  func.func @transform_6(%arg0: i32, %arg1: i32) -> (i32, i32) {
    %c0_i32 = arith.constant 0 : i32
    %c0_i32_0 = arith.constant 0 : i32
    %c0_i32_1 = arith.constant 0 : i32
    return %c0_i32, %c0_i32_0 : i32, i32
  }
  func.func @transform_7(%arg0: i32, %arg1: i32) -> (i32, i32) {
    %c0_i32 = arith.constant 0 : i32
    %c0_i32_0 = arith.constant 0 : i32
    %c0_i32_1 = arith.constant 0 : i32
    return %c0_i32, %c0_i32_0 : i32, i32
  }
  func.func @transform_8(%arg0: i32, %arg1: i32) -> (i32, i32) {
    %c0_i32 = arith.constant 0 : i32
    return %arg1, %arg0 : i32, i32
  }
  func.func @transform_9(%arg0: i32, %arg1: i32) -> (i32, i32, i32, i32) {
    %c0_i32 = arith.constant 0 : i32
    %c0_i32_0 = arith.constant 0 : i32
    %c0_i32_1 = arith.constant 0 : i32
    return %arg0, %c0_i32, %arg1, %c0_i32_0 : i32, i32, i32, i32
  }
}

</mosaic_0001>

<bundles_post_ra>
// kernel: tpu_custom_call.1
= control target key start
LH: loop header
LB: loop body
LE: loop exit
PB: predicated region body
PF: predicated region fallthrough
CT: control target
= control target key end

     0   :  { %s5134_s0 = inlined_call_operand.hbm [shape: f32[128,256], index: 0, kind: input, shape index: {}]   ;;  %s5135_s1 = inlined_call_operand.hbm [shape: bf16[128,256], index: 1, kind: input, shape index: {}]   ;;  %s5136_s2 = inlined_call_operand.hbm [shape: bf16[128,256], index: 2, kind: input, shape index: {}]   ;;  %s5137_s3 = inlined_call_operand.hbm [shape: f32[4,128,128], index: 3, kind: input, shape index: {}]   ;;  %s5138_s4 = inlined_call_operand.hbm [shape: bf16[128,128], index: 4, kind: input, shape index: {}]   ;;  %s5139_s5 = inlined_call_operand.hbm [shape: bf16[128,128], index: 5, kind: input, shape index: {}]   ;;  %s5140_s6 = inlined_call_operand.vmem [shape: f32[1,128], index: 6, kind: input, shape index: {}]   ;;  %s5141_s7 = inlined_call_operand.vmem [shape: f32[1,128], index: 7, kind: input, shape index: {}]   ;;  %s5142_s8 = inlined_call_operand.hbm [shape: f32[128,256], index: 8, kind: output, shape index: {0}]   ;;  %s5143_s9 = inlined_call_operand.hbm [shape: f32[2,4,128,128], index: 9, kind: output, shape index: {1}]  }
   0x1   :  { %5180 = sst [smem:[#allocation49_spill]] %s5135_s1 }
   0x2   :  { %5181 = sst [smem:[#allocation50_spill]] %s5138_s4 }
   0x3   :  { %5182 = sst [smem:[#allocation51_spill]] %s5139_s5 }
   0x4   :  { %5183 = sst [smem:[#allocation52_spill]] %s5140_s6 }
   0x5   :  { %5184 = sst [smem:[#allocation53_spill]] %s5141_s7 }
   0x6   :  { %5185 = sst [smem:[#allocation54_spill]] %s5142_s8 }
   0x7   :  { %5186 = sst [smem:[#allocation55_spill]] %s5143_s9 }
   0x8   :  { %15 = vsyncpa [#allocation4], 0 }
   0x9   :  { %17 = vsyncpa [#allocation4 + $0x1], 0 }
   0xa   :  { %18 = vsyncpa [#allocation7], 0 }
   0xb   :  { %20 = vsyncpa [#allocation7 + $0x1], 0 }
   0xc   :  { %21 = vsyncpa [#allocation10], 0 }
   0xd   :  { %23 = vsyncpa [#allocation10 + $0x1], 0 }
   0xe   :  { %24 = vsyncpa [#allocation13], 0 }
   0xf   :  { %25 = vsyncpa [#allocation5], 0 }
  0x10   :  { %27 = vsyncpa [#allocation5 + $0x1], 0 }
  0x11   :  { %28 = vsyncpa [#allocation16], 0 }
  0x12   :  { %30 = vsyncpa [#allocation16 + $0x1], 0  ;;  %s3964_s30 = smov 0   ;;  %s3966_s10 = smov 0  }
  0x13   :  { %s3968_s11 = smov 0   ;;  %s3970_s12 = smov 0  }
  0x14   :  { %s3972_s13 = smov 0   ;;  %s3974_s14 = smov 0  }
  0x15   :  { %s3976_s15 = smov 0   ;;  %s3978_s16 = smov 0  }
  0x16   :  { %s3980_s17 = smov 0   ;;  %s3982_s18 = smov 0  }
  0x17   :  { %s3984_s19 = smov 0   ;;  %s3986_s20 = smov 0  }
  0x18   :  { %s3988_s21 = smov 0   ;;  %s3990_s22 = smov 0  }
  0x19 LB: > { %5187 = sst [smem:[#allocation29_spill]] %s3834_s10  ;;  %s4035_s23 = sadd.s32 4294967295, %s3882_s22   ;;  %s3882_s22 = sphi %s3990_s22, %s36_s22   ;;  %s3878_s21 = sphi %s3988_s21, %s5273_s21   ;;  %s3874_s20 = sphi %s3986_s20, %s5272_s20   ;;  %s3870_s19 = sphi %s3984_s19, %s5271_s19   ;;  %s3866_s18 = sphi %s3982_s18, %s5270_s18   ;;  %s3862_s17 = sphi %s3980_s17, %s5269_s17   ;;  %s3858_s16 = sphi %s3978_s16, %s5268_s16   ;;  %s3854_s15 = sphi %s3976_s15, %s5262_s15   ;;  %s3850_s14 = sphi %s3974_s14, %s5261_s14   ;;  %s3846_s13 = sphi %s3972_s13, %s5260_s13   ;;  %s3842_s12 = sphi %s3970_s12, %s5259_s12   ;;  %s3838_s11 = sphi %s3968_s11, %s5267_s11   ;;  %s3834_s10 = sphi %s3966_s10, %s5266_s10   ;;  %s3830_s30 = sphi %s3964_s30, %s5257_s30  }
  0x1a   : > { %5188 = sst [smem:[#allocation30_spill]] %s3846_s13  ;;  %s45_s25 = sadd.s32 1, %s3874_s20 }
  0x1b   : > { %5189 = sst [smem:[#allocation31_spill]] %s3850_s14  ;;  %s48_s26 = sadd.s32 1, %s3878_s21 }
  0x1c   : > { %5190 = sst [smem:[#allocation32_spill]] %s3854_s15  ;;  %p46_p0 = scmp.ge.s32.totalorder %s45_s25, 2 }
  0x1d   : > { %5191 = sst [smem:[#allocation33_spill]] %s3858_s16  ;;  %s57_s27 = sadd.s32 1, %s3862_s17 }
  0x1e   : > { %5192 = sst [smem:[#allocation34_spill]] %s3866_s18  ;;  %p5150_p1 = scmp.ne.s32.totalorder %s3862_s17, %s3858_s16 }
  0x1f   : > { %5193 = sst [smem:[#allocation35_spill]] %s3870_s19  ;;  %p65_p2 = scmp.eq.s32.totalorder %s3882_s22, 0 }
  0x20   : > { %5194 = sst [smem:[#allocation36_spill]] %s3882_s22  ;;  %s5275_s25 = smov (%p46_p0, %s45_s25), 0 }
  0x21   : > { %5195 = sst [smem:[#allocation37_spill]] %s4035_s23  ;;  %s5277_s26 = smov (!%p46_p0, %s48_s26), %s3878_s21 }
  0x22   : > { %5196 = sst [smem:[#allocation38_spill]] %s5275_s25  ;;  %s52_s28 = ssub.s32 %s3874_s20, %s5275_s25 }
  0x23   : > { %p4054_p3 = por %p65_p2, %p5150_p1  ;;  %p50_p4 = scmp.ge.s32.totalorder %s5277_s26, 2 }
  0x24   : > { %p5149_p5 = scmp.ne.s32.totalorder %s3858_s16, %s3854_s15  ;;  %p5163_p6 = scmp.eq.s32.totalorder %s4035_s23, 0 }
  0x25   : > { %s5197_s29 = scalar_select %p4054_p3, 1, 0 }
  0x26   : > { %s83_s24 = sadd.s32 1, %s3850_s14  ;;  %s5279_s26 = smov (%p50_p4, %s5277_s26), 0 }
  0x27   : > { %5198 = sst [smem:[#allocation39_spill]] %s5279_s26  ;;  %p4069_p7 = por %p5163_p6, %p5149_p5 }
  0x28   : > { %p90_p8 = scmp.ne.s32.totalorder %s3850_s14, %s3846_s13  ;;  %s53_s9 = ssub.s32 %s3878_s21, %s5279_s26 }
  0x29   : > { %s5199_s25 = scalar_select %p4069_p7, 1, 0 }
  0x2a   : > { %p96_p9 = scmp.ne.s32.totalorder %s3846_s13, %s3842_s12  ;;  %s54_s8 = sor.u32 %s53_s9, %s52_s28 }
  0x2b   : > { %5200 = sst [smem:[#allocation40_spill]] %s5199_s25  ;;  %p81_p10 = scmp.eq.s32.totalorder %s53_s9, 0 }
  0x2c   : > { %p55_p11 = scmp.eq.s32.totalorder %s54_s8, 0  ;;  %p4081_p12 = por %p90_p8, %p65_p2 }
  0x2d   : > { %s4086_s18 = scalar_select %p81_p10, %s3850_s14, %s83_s24  }
  0x2e   : > { %s5201_s19 = scalar_select %p4081_p12, 1, 0 }
  0x2f   : > { %5202 = sst [smem:[#allocation41_spill]] %s4086_s18  ;;  %p4093_p13 = por %p96_p9, %p5163_p6 }
  0x30   : > { %s4089_s26 = scalar_select %p55_p11, %s3862_s17, %s57_s27  }
  0x31   : > { %s5204_s12 = scalar_select %p4093_p13, 1, 0 }
  0x32   : > { %5203 = sst [smem:[#allocation42_spill]] %s4089_s26  ;;  %p133_p0 = scmp.eq.s32.totalorder %s52_s28, 0 }
  0x33   : > { %5205 = sst [smem:[#allocation43_spill]] %s5204_s12  ;;  %s135_s9 = sadd.s32 1, %s3838_s11 }
  0x34   : > { %p142_p4 = scmp.ne.s32.totalorder %s3838_s11, %s3834_s10  ;;  %p148_p10 = scmp.ne.s32.totalorder %s3834_s10, %s3830_s30 }
  0x35   : > { %s4101_s8 = scalar_select %p133_p0, %s3838_s11, %s135_s9  }
  0x36   : > { %p4105_p8 = por %p142_p4, %p65_p2  ;;  %p258_p5 = scmp.eq.s32.totalorder %s4035_s23, 3 }
  0x37   : > { %5206 = sst [smem:[#allocation44_spill]] %s4101_s8  ;;  %s5208_s24 = sadd.s32 4294967294, %s3882_s22  }
  0x38   : > { %s5207_s7 = scalar_select %p4105_p8, 1, 0 }
  0x39   : > { %p264_p11 = scmp.eq.s32.totalorder %s5208_s24, 3  ;;  %p4116_p9 = por %p148_p10, %p5163_p6 }
  0x3a   : > { %p2661_p1 = scmp.ge.s32.totalorder %s3882_s22, 1  ;;  %p5211_p13 = scmp.ne.s32.totalorder %s3862_s17, %s3858_s16 }
  0x3b   : > { %s5209_s27 = scalar_select %p4116_p9, 1, 0 }
  0x3c   : > { %p4124_p7 = por %p258_p5, %p5211_p13  ;;  %p5214_p2 = scmp.ne.s32.totalorder %s3858_s16, %s3854_s15 }
  0x3d   : > { %5210 = sst [smem:[#allocation45_spill]] %s5209_s27  ;;  %p299_p4 = scmp.lt.s32.totalorder %s3882_s22, 5 }
  0x3e   : > { %s5212_s28 = scalar_select %p4124_p7, 1, 0 }
  0x3f   : > { %p4131_p0 = por %p264_p11, %p5214_p2  ;;  %p4136_p8 = pnand %p2661_p1, %p299_p4 }
  0x40   : > { %5213 = sst [smem:[#allocation46_spill]] %s5212_s28  ;;  %s3884_s24 = smov [#allocation11]  }
  0x41   : > { %s5215_s9 = scalar_select %p4131_p0, 1, 0 }
  0x42   : > { %s5217_s30 = scalar_select %p4136_p8, 1, 0 }
  0x43   : > { %5216 = sst [smem:[#allocation47_spill]] %s5215_s9  ;;  %s311_s26 = sshll.u32 %s3884_s24, 4  ;;  %s312_s26 = int_to_ptr.vmem [resolvable:$true] %s311_s26 }
  0x44   : > { %5218 = sst [smem:[#allocation48_spill]] %s5217_s30  ;;  %p3223_p10 = pneg %p4136_p8 }
  0x45   : > { %s3885_s18 = smov [#allocation12]   ;;  %s5220_s4 = sld [smem:[#allocation50_spill]] }
  0x46   : > { %s324_s8 = sshll.u32 %s3885_s18, 4  ;;  %p4144_p5 = pnand %p3223_p10, %p5163_p6  ;;  %s4148_s8 = int_to_ptr.vmem [resolvable:$true] %s324_s8 }
  0x48   : > { %p3578_p13 = pneg %p4144_p5 }
  0x4b   : > { %s3576_s6 = scalar_lea.hbm %s5220_s4, 1024 }
  0x4c   : > { %p3577_p1 = scmp.ne.s32.totalorder %s5220_s4, %s3576_s6  ;;  %p3583_p4 = scmp.lt.u32.totalorder %s3576_s6, %s5220_s4 }
  0x4e   : > { %p3579_p11 = pnand %p3578_p13, %p3577_p1 }
  0x50   : > { %p3580_p2 = pneg %p3579_p11 }
  0x52   : > { %p3585_p10 = pnand %p3583_p4, %p3580_p2 }
  0x54   : > { %3588 = shalt.err (!%p3585_p10)
}
  0x55   : > { %s3589_s12 = scalar_lea.vmem %s312_s26, 1024  ;;  %p3597_p9 = scmp.lt.s32.totalorder %s312_s26, %s312_s26 }
  0x56   : > { %p3590_p6 = scmp.ne.s32.totalorder %s312_s26, %s3589_s12  ;;  %p3598_p8 = scmp.lt.s32.totalorder %s3589_s12, %s3589_s12 }
  0x58   : > { %p3592_p0 = pnand %p3590_p6, %p3578_p13  ;;  %p3599_p3 = por %p3598_p8, %p3597_p9 }
  0x5a   : > { %p3593_p7 = pneg %p3592_p0 }
  0x5c   : > { %p3600_p12 = pnand %p3599_p3, %p3593_p7 }
  0x5e   : > { %3603 = shalt.err (!%p3600_p12)
}
  0x5f   : > { %s3886_s27 = smov 64   ;;  %s3887_s28 = smov 4  }
  0x60   : > { %3226 = dma.hbm_to_vmem [thread:$0]  (!%p4144_p5), %s5220_s4, 1024, %s312_s26, [#allocation10], %s3886_s27, %s3886_s27, %s3887_s28  }
  0x61   : > { %s5221_s5 = sld [smem:[#allocation51_spill]] }
  0x67   : > { %s3604_s18 = scalar_lea.hbm %s5221_s5, 1024 }
  0x68   : > { %p3605_p6 = scmp.ne.s32.totalorder %s5221_s5, %s3604_s18  ;;  %p3611_p12 = scmp.lt.u32.totalorder %s3604_s18, %s5221_s5 }
  0x6a   : > { %p3607_p3 = pnand %p3605_p6, %p3578_p13 }
  0x6c   : > { %p3608_p7 = pneg %p3607_p3 }
  0x6e   : > { %p3613_p8 = pnand %p3611_p12, %p3608_p7 }
  0x70   : > { %3616 = shalt.err (!%p3613_p8)
}
  0x71   : > { %s3617_s26 = scalar_lea.vmem %s4148_s8, 1024  ;;  %p3625_p11 = scmp.lt.s32.totalorder %s4148_s8, %s4148_s8 }
  0x72   : > { %p3618_p9 = scmp.ne.s32.totalorder %s4148_s8, %s3617_s26  ;;  %p3626_p2 = scmp.lt.s32.totalorder %s3617_s26, %s3617_s26 }
  0x74   : > { %p3620_p0 = pnand %p3618_p9, %p3578_p13  ;;  %p3627_p4 = por %p3626_p2, %p3625_p11 }
  0x76   : > { %p3621_p1 = pneg %p3620_p0 }
  0x78   : > { %p3628_p10 = pnand %p3627_p4, %p3621_p1 }
  0x7a   : > { %3631 = shalt.err (!%p3628_p10)
}
  0x7b   : > { %3229 = dma.hbm_to_vmem [thread:$0]  (!%p4144_p5), %s5221_s5, 1024, %s4148_s8, [#allocation13], %s3886_s27, %s3886_s27, %s3887_s28  }
  0x7c   : > { %p2664_p6 = scmp.ge.s32.totalorder %s3882_s22, 4 }
  0x7d   : > { %s5174_s25 = sand.u32 (!%p2664_p6), 1, %s3882_s22   ;;  %s369_s6 = sand.u32 (!%p2664_p6), 1, %s3850_s14  }
  0x7e   : > { %340 = sbr.rel (%p2664_p6) target bundleno = 222 (0xde), region = 32  ;;  %s4200_s10 = sshll.u32 (!%p2664_p6), %s369_s6, 6 }
  0x7f   : > { %s2670_s15 = sshll.u32 (!%p2664_p6), %s3878_s21, 6  ;;  %s5222_s1 = sld [smem:[#allocation49_spill]] (!%p2664_p6) }
  0x80   : > { %s371_s27 = scalar_lea.vmem (!%p2664_p6), [#allocation6], %s4200_s10  ;;  %s4215_s18 = scalar_lea.sflag (!%p2664_p6), [#allocation7], %s5174_s25 }
  0x81   : > { %s377_s28 = sshll.u32 (!%p2664_p6), %s371_s27, 4  ;;  %p5223_p13 = scmp.ne.s32.totalorder (!%p2664_p6), %s5201_s19, 0  ;;  %s4211_s28 = int_to_ptr.vmem [resolvable:$true] %s377_s28 }
  0x85   : > { %s4208_s8 = scalar_lea.hbm %s5222_s1, %s2670_s15  ;;  %s3636_s23 = scalar_lea.hbm %s5222_s1, 2048 }
  0x86   : > { %s3632_s12 = scalar_lea.hbm %s4208_s8, 1024  ;;  %p3637_p12 = scmp.lt.u32.totalorder %s4208_s8, %s5222_s1 }
  0x87   : > { %p3633_p5 = scmp.ne.s32.totalorder %s4208_s8, %s3632_s12  ;;  %p3638_p8 = scmp.lt.u32.totalorder %s3636_s23, %s3632_s12 }
  0x88   : > { %p3640_p0 = scmp.lt.u32.totalorder %s3632_s12, %s4208_s8 }
  0x89   : > { %p3634_p3 = pnand %p3633_p5, %p5223_p13  ;;  %p3639_p9 = por %p3638_p8, %p3637_p12 }
  0x8b   : > { %p3635_p7 = pneg %p3634_p3  ;;  %p3641_p1 = por %p3640_p0, %p3639_p9 }
  0x8d   : > { %p3642_p11 = pnand %p3641_p1, %p3635_p7 }
  0x8f   : > { %3645 = shalt.err (!%p3642_p11)
}
  0x90   : > { %s3646_s24 = scalar_lea.vmem %s4211_s28, 1024  ;;  %s3888_s27 = smov [#allocation6]  }
  0x91   : > { %p3647_p2 = scmp.ne.s32.totalorder %s4211_s28, %s3646_s24  ;;  %s3650_s26 = sshll.u32 %s3888_s27, 4  ;;  %s3651_s26 = int_to_ptr.vmem [resolvable:$false] %s3650_s26 }
  0x92   : > { %s3652_s13 = scalar_lea.vmem %s3651_s26, 2048  ;;  %p3653_p6 = scmp.lt.s32.totalorder %s4211_s28, %s3651_s26 }
  0x93   : > { %p3648_p4 = pnand %p3647_p2, %p5223_p13  ;;  %p3654_p5 = scmp.lt.s32.totalorder %s3652_s13, %s3646_s24 }
  0x95   : > { %p3649_p10 = pneg %p3648_p4  ;;  %p3655_p3 = por %p3654_p5, %p3653_p6 }
  0x97   : > { %p3656_p12 = pnand %p3655_p3, %p3649_p10 }
  0x99   : > { %3659 = shalt.err (!%p3656_p12)
}
  0x9a   : > { %s3889_s12 = smov 128   ;;  %s3890_s23 = smov 64  }
  0x9b   : > { %s3891_s6 = smov 4   ;;  %s4247_s27 = scalar_lea.hbm %s5136_s2, %s2670_s15 }
  0x9c   : > { %3195 = dma.hbm_to_vmem [thread:$0]  (%p5223_p13), %s4208_s8, 1024, %s4211_s28, %s4215_s18, %s3889_s12, %s3890_s23, %s3891_s6  }
  0x9d   : > { %s391_s26 = scalar_lea.vmem [#allocation8], %s4200_s10  ;;  %s344_s25 = sand.u32 1, %s3862_s17  }
  0x9e   : > { %s397_s13 = sshll.u32 %s391_s26, 4  ;;  %s2665_s1 = sshll.u32 %s344_s25, 6  ;;  %s4251_s13 = int_to_ptr.vmem [resolvable:$true] %s397_s13 }
  0x9f   : > { %s2795_s4 = sshll.u32 %s3874_s20, 4  ;;  %s348_s16 = scalar_lea.vmem [#allocation3], %s2665_s1 }
  0xa0   : > { %s354_s5 = sadd.s32 %s3878_s21, %s2795_s4  ;;  %s357_s30 = sshll.u32 %s348_s16, 4  ;;  %s4260_s30 = int_to_ptr.vmem [resolvable:$true] %s357_s30 }
  0xa1   : > { %s2668_s14 = sshll.u32 %s354_s5, 7  ;;  %s4262_s10 = scalar_lea.sflag [#allocation4], %s344_s25 }
  0xa2   : > { %s4258_s28 = scalar_lea.hbm %s5134_s0, %s2668_s14  ;;  %p5224_p8 = scmp.ne.s32.totalorder %s5197_s29, 0 }
  0xa3   : > { %s3660_s15 = scalar_lea.hbm %s4258_s28, 1024  ;;  %s3664_s5 = scalar_lea.hbm %s5134_s0, 4096 }
  0xa4   : > { %p3661_p7 = scmp.ne.s32.totalorder %s4258_s28, %s3660_s15  ;;  %p3665_p1 = scmp.lt.u32.totalorder %s4258_s28, %s5134_s0 }
  0xa5   : > { %p3666_p11 = scmp.lt.u32.totalorder %s3664_s5, %s3660_s15  ;;  %p3668_p4 = scmp.lt.u32.totalorder %s3660_s15, %s4258_s28 }
  0xa6   : > { %p3662_p9 = pnand %p3661_p7, %p5224_p8 }
  0xa7   : > { %p3667_p2 = por %p3666_p11, %p3665_p1 }
  0xa8   : > { %p3663_p0 = pneg %p3662_p9 }
  0xa9   : > { %p3669_p10 = por %p3668_p4, %p3667_p2 }
  0xab   : > { %p3670_p6 = pnand %p3669_p10, %p3663_p0 }
  0xad   : > { %3673 = shalt.err (!%p3670_p6)
}
  0xae   : > { %s3674_s22 = scalar_lea.vmem %s4260_s30, 1024  ;;  %s3892_s25 = smov [#allocation3]  }
  0xaf   : > { %p3675_p5 = scmp.ne.s32.totalorder %s4260_s30, %s3674_s22  ;;  %s3678_s9 = sshll.u32 %s3892_s25, 4  ;;  %s3679_s9 = int_to_ptr.vmem [resolvable:$false] %s3678_s9 }
  0xb0   : > { %s3680_s24 = scalar_lea.vmem %s3679_s9, 2048  ;;  %p3681_p7 = scmp.lt.s32.totalorder %s4260_s30, %s3679_s9 }
  0xb1   : > { %p3676_p3 = pnand %p3675_p5, %p5224_p8  ;;  %p3682_p9 = scmp.lt.s32.totalorder %s3680_s24, %s3674_s22 }
  0xb3   : > { %p3677_p12 = pneg %p3676_p3  ;;  %p3683_p1 = por %p3682_p9, %p3681_p7 }
  0xb5   : > { %p3684_p11 = pnand %p3683_p1, %p3677_p12 }
  0xb7   : > { %3687 = shalt.err (!%p3684_p11)
}
  0xb8   : > { %s3893_s26 = smov 256   ;;  %s3894_s8 = smov 8  }
  0xb9   : > { %3194 = dma.hbm_to_vmem [thread:$0]  (%p5224_p8), %s4258_s28, 1024, %s4260_s30, %s4262_s10, %s3893_s26, %s3889_s12, %s3894_s8  }
  0xba   : > { %s3688_s15 = scalar_lea.hbm %s4247_s27, 1024  ;;  %s3692_s5 = scalar_lea.hbm %s5136_s2, 2048 }
  0xbb   : > { %p3689_p0 = scmp.ne.s32.totalorder %s4247_s27, %s3688_s15  ;;  %p3693_p10 = scmp.lt.u32.totalorder %s4247_s27, %s5136_s2 }
  0xbc   : > { %p3694_p6 = scmp.lt.u32.totalorder %s3692_s5, %s3688_s15  ;;  %p3696_p3 = scmp.lt.u32.totalorder %s3688_s15, %s4247_s27 }
  0xbd   : > { %p3690_p2 = pnand %p3689_p0, %p5223_p13 }
  0xbe   : > { %p3695_p5 = por %p3694_p6, %p3693_p10 }
  0xbf   : > { %p3691_p4 = pneg %p3690_p2 }
  0xc0   : > { %p3697_p12 = por %p3696_p3, %p3695_p5 }
  0xc2   : > { %p3698_p7 = pnand %p3697_p12, %p3691_p4 }
  0xc4   : > { %3701 = shalt.err (!%p3698_p7)
}
  0xc5   : > { %s3702_s29 = scalar_lea.vmem %s4251_s13, 1024  ;;  %s3895_s30 = smov [#allocation8]  }
  0xc6   : > { %p3703_p8 = scmp.ne.s32.totalorder %s4251_s13, %s3702_s29  ;;  %s3706_s28 = sshll.u32 %s3895_s30, 4  ;;  %s3707_s28 = int_to_ptr.vmem [resolvable:$false] %s3706_s28 }
  0xc7   : > { %s3708_s10 = scalar_lea.vmem %s3707_s28, 2048  ;;  %p3709_p11 = scmp.lt.s32.totalorder %s4251_s13, %s3707_s28 }
  0xc8   : > { %p3704_p9 = pnand %p3703_p8, %p5223_p13  ;;  %p3710_p0 = scmp.lt.s32.totalorder %s3708_s10, %s3702_s29 }
  0xca   : > { %p3705_p1 = pneg %p3704_p9  ;;  %p3711_p2 = por %p3710_p0, %p3709_p11 }
  0xcc   : > { %p3712_p10 = pnand %p3711_p2, %p3705_p1 }
  0xce   : > { %3715 = shalt.err (!%p3712_p10)
}
  0xcf   : > { %3196 = dma.hbm_to_vmem [thread:$0]  (%p5223_p13), %s4247_s27, 1024, %s4251_s13, %s4215_s18, %s3889_s12, %s3890_s23, %s3891_s6  }
  0xd0   : > { %s409_s22 = sand.u32 1, %s3838_s11   ;;  %s2796_s9 = sshll.u32 %s3874_s20, 10 }
  0xd1   : > { %s2673_s25 = sshll.u32 %s409_s22, 8  ;;  %p5225_p4 = scmp.ne.s32.totalorder %s5207_s7, 0 }
  0xd2   : > { %s417_s8 = scalar_lea.hbm %s5137_s3, %s2796_s9  ;;  %s5226_s18 = sld [smem:[#allocation36_spill]] }
  0xd3   : > { %s3197_s19 = scalar_select %p5225_p4, [#allocation0], [#allocation21] }
  0xd4   : > { %s411_s12 = scalar_lea.vmem [#allocation9], %s2673_s25  ;;  %s3896_s6 = smov 2048  }
  0xd5   : > { %s422_s15 = sld [smem:[%s3197_s19]]   ;;  %s430_s23 = sshll.u32 %s411_s12, 4  ;;  %s431_s23 = int_to_ptr.vmem [resolvable:$true] %s430_s23 }
  0xd6   : > { %3198 = sst [smem:[#allocation18]] (%p5225_p4), %s3896_s6  ;;  %s3897_s27 = smov 1024  }
  0xd7   : > { %3199 = sst [smem:[#allocation18 + $0x1]] (%p5225_p4), %s3897_s27  ;;  %s3898_s13 = smov 8  }
  0xd8   : > { %3200 = sst [smem:[#allocation18 + $0x2]] (%p5225_p4), %s3898_s13  ;;  %s3899_s1 = smov 128  }
  0xd9   : > { %3201 = sst [smem:[#allocation18 + $0x3]] (%p5225_p4), %s3899_s1  ;;  %s5227_s16 = sand.u32 1, %s5226_s18  }
  0xda   : > { %3202 = sst [smem:[#allocation18 + $0x4]] (%p5225_p4), %s3899_s1  ;;  %s408_s14 = scalar_lea.sflag [#allocation10], %s5227_s16 }
  0xdb   : > { %s2676_s4 = sshll.u32 %s422_s15, 26  ;;  %3203 = sst [smem:[#allocation18 + $0x5]] (%p5225_p4), %s3898_s13 }
  0xdc   : > { %s2677_s5 = sadd.s32 134217728, %s2676_s4  ;;  %s3900_s29 = smov [#allocation17]  }
  0xdd   : > { %3204 = dma.general (%p5225_p4), %s417_s8, 4096, %s431_s23, %s408_s14, %s3900_s29, [#allocation18], %s2677_s5, 0  }
  0xde PF: > { %s5228_s30 = sld [smem:[#allocation48_spill]] }
  0xe4   : > { %p5229_p13 = scmp.ne.s32.totalorder %s5228_s30, 0 }
  0xe5   : > { %s5230_s28 = sld [smem:[#allocation33_spill]] (!%p5229_p13)  ;;  %s5231_s10 = sld [smem:[#allocation40_spill]] (!%p5229_p13) }
  0xe6   : > { %455 = sbr.rel (%p5229_p13) target bundleno = 3825 (0xef1), region = 52 }
  0xeb   : > { %s4338_s22 = sand.u32 (!%p5229_p13), 1, %s5230_s28   ;;  %p5232_p6 = scmp.ne.s32.totalorder (!%p5229_p13), %s5231_s10, 0 }
  0xec   : > { %s2679_s25 = sshll.u32 (!%p5229_p13), %s4338_s22, 6  ;;  %s458_s9 = scalar_lea.sflag (!%p5229_p13), [#allocation4], %s4338_s22 }
  0xed   : > { %s4344_s19 = scalar_lea.vmem [#allocation3], %s2679_s25 }
  0xee   : > { %3801 = dma.done.wait (%p5232_p6), %s458_s9, 1024  }
  0xef   : > { %3803 = vsyncadd (%p5232_p6), %s458_s9, 4294966272  ;;  %s5233_s7 = sld [smem:[#allocation37_spill]]  ;;  %s5234_s24 = sld [smem:[#allocation30_spill]] }
  0xf0   : > { %s5235_s26 = sld [smem:[#allocation43_spill]] }
  0xf5   : > { %s466_s8 = sand.u32 1, %s5233_s7   ;;  %s468_s15 = sand.u32 1, %s5234_s24  }
  0xf6   : > { %s2680_s18 = sshll.u32 %s468_s15, 6  ;;  %s467_s12 = scalar_lea.sflag [#allocation7], %s466_s8 }
  0xf7   : > { %s4352_s23 = scalar_lea.vmem [#allocation6], %s2680_s18  ;;  %p5236_p5 = scmp.ne.s32.totalorder %s5235_s26, 0 }
  0xf9   : > { %3805 = dma.done.wait (%p5236_p5), %s467_s12, 2048  }
  0xfa   : > { %3807 = vsyncadd (%p5236_p5), %s467_s12, 4294965248  ;;  %s5237_s6 = sld [smem:[#allocation29_spill]]  ;;  %s4359_s4 = scalar_lea.vmem [#allocation8], %s2680_s18 }
  0xfb   : > { %s5238_s27 = sld [smem:[#allocation45_spill]]  ;;  %s485_s5 = scalar_lea.sflag [#allocation10], %s466_s8 }
 0x100   : > { %s486_s13 = sand.u32 1, %s5237_s6  }
 0x101   : > { %s2682_s1 = sshll.u32 %s486_s13, 8  ;;  %p5239_p3 = scmp.ne.s32.totalorder %s5238_s27, 0 }
 0x102   : > { %s4361_s16 = scalar_lea.vmem [#allocation9], %s2682_s1 }
 0x103   : > { %3809 = dma.done.wait (%p5239_p3), %s485_s5, 4096  }
 0x104   : > { %3811 = vsyncadd (%p5239_p3), %s485_s5, 4294963200  ;;  %p5240_p12 = scmp.eq.s32.totalorder %s5233_s7, 0 }
 0x106   : > { %3813 = dma.done.wait (%p5240_p12), [#allocation10], 1024   ;;  %p5241_p7 = pmov %p5240_p12 }
 0x108   : > { %3815 = vsyncadd (%p5241_p7), [#allocation10], 4294966272  ;;  %p5242_p8 = pmov %p5241_p7 }
 0x109   : > { %p5243_p9 = pmov %p5241_p7 }
 0x10a   : > { %3817 = dma.done.wait (%p5242_p8), [#allocation13], 1024  }
 0x10b   : > { %3819 = vsyncadd (%p5243_p9), [#allocation13], 4294966272  ;;  %v3380_v0 = vld [vmem:[#allocation11] sm:$0xff]   ;;  %v3381_v1 = vld [vmem:[#allocation11 + $0x8] sm:$0xff]   ;;  %vm773_vm0 = vcmask 261120   ;;  %s3901_s14 = smov 96  }
 0x10c   : > { %2918 = vmatprep.subr.bf16.mxu0 %v3380_v0  ;;  %v3382_v2 = vld [vmem:[#allocation11 + $0x10] sm:$0xff]   ;;  %v3383_v3 = vld [vmem:[#allocation11 + $0x18] sm:$0xff]   ;;  %v4376_v4 = vld [vmem:[%s4352_s23] sm:$0xff]   ;;  %s2686_s29 = sshll.u32 %s4338_s22, 8  ;;  %s3902_s28 = smov 64   ;;  %vm1436_vm1 = vcmask 523520  }
 0x10d   : > { %2919 = vmatpush3.bf16.msra.mxu0 %v3380_v0  ;;  %v4379_v5 = vld [vmem:[%s4352_s23 + $0x8] sm:$0xff]   ;;  %v3384_v6 = vld [vmem:[#allocation11 + $0x20] sm:$0xff]   ;;  %3158 = vmatprep.subr.msk.bf16.mxu1 %vm773_vm0, %v4376_v4  ;;  %v787_v7 = vsel %vm773_vm0, %v4376_v4, 0  ;;  %v4388_v8 = vld [vmem:[%s4352_s23 + $0x10] sm:$0xff]   ;;  %s4557_s30 = scalar_lea.vmem [#allocation15], %s2686_s29  ;;  %s3903_s10 = smov 32  }
 0x10e   : > { %2920 = vmatprep.subr.bf16.mxu0 %v3381_v1  ;;  %2943 = vmatpush3.bf16.xpose.msra.mxu1 %v787_v7  ;;  %v3385_v9 = vld [vmem:[#allocation11 + $0x28] sm:$0xff]   ;;  %v3386_v10 = vld [vmem:[#allocation11 + $0x30] sm:$0xff]   ;;  %v790_v11 = vsel %vm773_vm0, %v4379_v5, 0  ;;  %v793_v12 = vsel %vm773_vm0, %v4388_v8, 0  ;;  %v3387_v13 = vld [vmem:[#allocation11 + $0x38] sm:$0xff]   ;;  %vm1777_vm2 = vcmask 785920  }
 0x10f   : > { %3159 = vmatprep.subr.msk.bf16.mxu1 %vm773_vm0, %v4379_v5  ;;  %v4397_v14 = vld [vmem:[%s4352_s23 + $0x18] sm:$0xff]   ;;  %v558_v15 = vld [vmem:[%s4344_s19 + $0x10] sm:$0xff]  ;;  %v4406_v19 = vld [vmem:[%s4352_s23 + $0x20] sm:$0xff]   ;;  %vm2118_vm3 = vcmask 1048320   ;;  %s5244_s7 = sld [smem:[#allocation52_spill]]  ;;  %s5245_s8 = sld [smem:[#allocation53_spill]] }
 0x110   : > { %v559_v16 = vld [vmem:[%s4344_s19 + $0x18] sm:$0xff]  ;;  %v796_v18 = vsel %vm773_vm0, %v4397_v14, 0  ;;  %v562_v20 = vld [vmem:[%s4344_s19 + $0x30] sm:$0xff]  ;;  %v799_v23 = vsel %vm773_vm0, %v4406_v19, 0  ;;  %v4415_v24 = vld [vmem:[%s4352_s23 + $0x28] sm:$0xff]   ;;  %s5011_s15 = scalar_lea.vmem [#allocation14], %s2679_s25 }
 0x111   : > { %2921 = vmatpush3.bf16.msra.mxu0 %v3381_v1  ;;  %v565_v17 = vpack.c.bf16 %v559_v16, %v558_v15  ;;  %v563_v21 = vld [vmem:[%s4344_s19 + $0x38] sm:$0xff]  ;;  %v802_v25 = vsel %vm773_vm0, %v4415_v24, 0  ;;  %v4422_v26 = vld [vmem:[%s4352_s23 + $0x30] sm:$0xff]   ;;  %v4452_v42 = vld [vmem:[%s4359_s4] sm:$0xff]   ;;  %s5246_s18 = sld [smem:[#allocation34_spill]]  ;;  %s5247_s12 = sld [smem:[#allocation35_spill]] }
 0x112   : > { %2922 = vmatprep.subr.bf16.mxu0 %v3382_v2  ;;  %v567_v22 = vpack.c.bf16 %v563_v21, %v562_v20  ;;  %v805_v27 = vsel %vm773_vm0, %v4422_v26, 0  ;;  %v4429_v28 = vld [vmem:[%s4352_s23 + $0x38] sm:$0xff]   ;;  %v4455_v43 = vld [vmem:[%s4359_s4 + $0x8] sm:$0xff]   ;;  %v4462_v44 = vld [vmem:[%s4359_s4 + $0x10] sm:$0xff]   ;;  %s5248_s6 = sld [smem:[#allocation46_spill]]  ;;  %s2404_s13 = sshll.u32 %s5011_s15, 4  ;;  %s5034_s13 = int_to_ptr.vmem [resolvable:$true] %s2404_s13 }
 0x113   : > { %v808_v29 = vsel %vm773_vm0, %v4429_v28, 0  ;;  %v4465_v45 = vld [vmem:[%s4359_s4 + $0x18] sm:$0xff]   ;;  %v4471_v46 = vld [vmem:[%s4359_s4 + $0x20] sm:$0xff]   ;;  %v4476_v47 = vld [vmem:[%s4359_s4 + $0x28] sm:$0xff]   ;;  %s5249_s5 = sld [smem:[#allocation54_spill]]  ;;  %s3716_s29 = scalar_lea.vmem %s5034_s13, 1024 }
 0x114   : > { %v4482_v56 = vld [vmem:[%s4359_s4 + $0x30] sm:$0xff]   ;;  %v4487_v57 = vld [vmem:[%s4359_s4 + $0x38] sm:$0xff]   ;;  %p3717_p1 = scmp.ne.s32.totalorder %s5034_s13, %s3716_s29 }
 0x115   : > { %2923 = vmatpush3.bf16.msra.mxu0 %v3382_v2 }
 0x116   : > { %2924 = vmatprep.subr.bf16.mxu0 %v3383_v3  ;;  %2945 = vmatpush3.bf16.xpose.msra.mxu1 %v790_v11 }
 0x117   : > { %3160 = vmatprep.subr.msk.bf16.mxu1 %vm773_vm0, %v4388_v8  ;;  %s2797_s25 = sshll.u32 %s5246_s18, 4 }
 0x118   : > { %p5250_p11 = scmp.ne.s32.totalorder %s5248_s6, 0 }
 0x119   : > { %2925 = vmatpush3.bf16.msra.mxu0 %v3383_v3 }
 0x11a   : > { %2926 = vmatprep.subr.bf16.mxu0 %v3384_v6  ;;  %p3718_p0 = pnand %p3717_p1, %p5250_p11 }
 0x11c   : > { %p3719_p2 = pneg %p3718_p0 }
 0x11d   : > { %2927 = vmatpush3.bf16.msra.mxu0 %v3384_v6 }
 0x11e   : > { %2928 = vmatprep.subr.bf16.mxu0 %v3385_v9  ;;  %2947 = vmatpush3.bf16.xpose.msra.mxu1 %v793_v12 }
 0x11f   : > { %3161 = vmatprep.subr.msk.bf16.mxu1 %vm773_vm0, %v4397_v14 }
 0x121   : > { %2929 = vmatpush3.bf16.msra.mxu0 %v3385_v9 }
 0x122   : > { %2930 = vmatprep.subr.bf16.mxu0 %v3386_v10 }
 0x125   : > { %2931 = vmatpush3.bf16.msra.mxu0 %v3386_v10 }
 0x126   : > { %2932 = vmatprep.subr.bf16.mxu0 %v3387_v13  ;;  %2949 = vmatpush3.bf16.xpose.msra.mxu1 %v796_v18 }
 0x127   : > { %3162 = vmatprep.subr.msk.bf16.mxu1 %vm773_vm0, %v4406_v19 }
 0x129   : > { %2933 = vmatpush3.bf16.msra.mxu0 %v3387_v13 }
 0x12a   : > { %2966 = vmatprep.subr.bf16.mxu0 %v4452_v42 }
 0x12c   : > { %2935 = vmatmul.mubr.bf16.vlgmr.msra.gmra.mrb[0].mxu0 %v565_v17 }
 0x12d   : > { %2967 = vmatpush3.bf16.msra.mxu0 %v4452_v42 }
 0x12e   : > { %2951 = vmatpush3.bf16.xpose.msra.mxu1 %v799_v23  ;;  %2968 = vmatprep.subr.bf16.mxu0 %v4455_v43 }
 0x12f   : > { %3163 = vmatprep.subr.msk.bf16.mxu1 %vm773_vm0, %v4415_v24 }
 0x131   : > { %2969 = vmatpush3.bf16.msra.mxu0 %v4455_v43 }
 0x132   : > { %2970 = vmatprep.subr.bf16.mxu0 %v4462_v44 }
 0x134   : > { %2939 = vmatmul.mubr.bf16.gmra.mrb[4].mxu0 %v567_v22 }
 0x135   : > { %2971 = vmatpush3.bf16.msra.mxu0 %v4462_v44 }
 0x136   : > { %2953 = vmatpush3.bf16.xpose.msra.mxu1 %v802_v25  ;;  %2972 = vmatprep.subr.bf16.mxu0 %v4465_v45 }
 0x137   : > { %3164 = vmatprep.subr.msk.bf16.mxu1 %vm773_vm0, %v4422_v26 }
 0x139   : > { %2973 = vmatpush3.bf16.msra.mxu0 %v4465_v45 }
 0x13a   : > { %2974 = vmatprep.subr.bf16.mxu0 %v4471_v46 }
 0x13d   : > { %2975 = vmatpush3.bf16.msra.mxu0 %v4471_v46 }
 0x13e   : > { %2955 = vmatpush3.bf16.xpose.msra.mxu1 %v805_v27  ;;  %2976 = vmatprep.subr.bf16.mxu0 %v4476_v47 }
 0x13f   : > { %3165 = vmatprep.subr.msk.bf16.mxu1 %vm773_vm0, %v4429_v28 }
 0x141   : > { %2977 = vmatpush3.bf16.msra.mxu0 %v4476_v47 }
 0x142   : > { %2978 = vmatprep.subr.bf16.mxu0 %v4482_v56 }
 0x145   : > { %2979 = vmatpush3.bf16.msra.mxu0 %v4482_v56 }
 0x146   : > { %2957 = vmatpush3.bf16.xpose.msra.mxu1 %v808_v29  ;;  %2980 = vmatprep.subr.bf16.mxu0 %v4487_v57 }
 0x149   : > { %2981 = vmatpush3.bf16.msra.mxu0 %v4487_v57 }
 0x1ff   : > { %v2936_v30 = vpop.f32.mrb[0].mxu0 }
 0x200   : > { %v666_v31 = vpop.f32.mrb[1].mxu0 }
 0x201   : > { %v2937_v32 = vpop.f32.mrb[2].mxu0 }
 0x202   : > { %v4435_v33 = vpack.c.bf16 %v2937_v32, %v2936_v30  ;;  %v669_v34 = vpop.f32.mrb[3].mxu0 }
 0x203   : > { %v4437_v35 = vpack.c.bf16 %v669_v34, %v666_v31 }
 0x205   : > { %2958 = vmatprep.mubr.msk.bf16.mxu1 %vm773_vm0, %v4437_v35 }
 0x206   : > { %2959 = vmatmul.mubr.msk.bf16.vlgmr.msra.gmra.mrb[0].mxu1 %vm773_vm0, %v4435_v33 }
 0x207   : > { %v2940_v36 = vpop.f32.mrb[4].mxu0 }
 0x208   : > { %v682_v37 = vpop.f32.mrb[5].mxu0 }
 0x209   : > { %v2941_v38 = vpop.f32.mrb[6].mxu0 }
 0x20a   : > { %v4443_v39 = vpack.c.bf16 %v2941_v38, %v2940_v36  ;;  %v685_v40 = vpop.f32.mrb[7].mxu0 }
 0x20b   : > { %v4445_v41 = vpack.c.bf16 %v685_v40, %v682_v37 }
 0x20d   : > { %2962 = vmatprep.mubr.msk.bf16.mxu1 %vm773_vm0, %v4445_v41 }
 0x20e   : > { %2963 = vmatmul.mubr.msk.bf16.gmra.mrb[4].mxu1 %vm773_vm0, %v4443_v39 }
 0x2d9   : > { %v2960_v48 = vpop.f32.mrb[0].mxu1 }
 0x2da   : > { %879 = vmax.xlane.f32.xlu1 %v2960_v48  ;;  %v844_v49 = vpop.f32.mrb[1].mxu1 }
 0x2db   : > { %875 = vmax.xlane.f32.xlu0 %v844_v49  ;;  %v2961_v50 = vpop.f32.mrb[2].mxu1 }
 0x2dc   : > { %v847_v51 = vpop.f32.mrb[3].mxu1 }
 0x2de   : > { %881 = vmax.xlane.f32.xlu1 %v2961_v50 }
 0x2df   : > { %877 = vmax.xlane.f32.xlu0 %v847_v51 }
 0x2e1   : > { %v2964_v52 = vpop.f32.mrb[4].mxu1 }
 0x2e2   : > { %v860_v53 = vpop.f32.mrb[5].mxu1 }
 0x2e3   : > { %v2965_v54 = vpop.f32.mrb[6].mxu1 }
 0x2e4   : > { %v863_v55 = vpop.f32.mrb[7].mxu1 }
 0x2ef   : > { %1110 = vrot.lane.b32.xlu1 %v4379_v5, %s3901_s14 }
 0x2f5   : > { %1108 = vrot.lane.b32.xlu0 %v4376_v4, %s3901_s14 }
 0x313   : > { %889 = vmax.xlane.f32.xlu1 %v2965_v54 }
 0x314   : > { %887 = vmax.xlane.f32.xlu0 %v2964_v52 }
 0x317   : > { %885 = vmax.xlane.f32.xlu1 %v863_v55 }
 0x318   : > { %883 = vmax.xlane.f32.xlu0 %v860_v53 }
 0x328   : > { %1112 = vrot.lane.b32.xlu1 %v4388_v8, %s3901_s14 }
 0x32e   : > { %1114 = vrot.lane.b32.xlu0 %v4397_v14, %s3901_s14 }
 0x367   : > { %v880_v58 = vpop.xlane.xlu1 %879 }
 0x368   : > { %v893_v59 = vsub.f32 %v2960_v48, %v880_v58  ;;  %v876_v60 = vpop.xlane.xlu0 %875 }
 0x369   : > { %v891_v61 = vsub.f32 %v844_v49, %v876_v60  ;;  %v958_v60 = vld [vmem:[%s4361_s16 + $0x18] sm:$0xff] }
 0x36a   : > { %v903_v62 = vmul.f32 1.442695, %v893_v59 }
 0x36b   : > { %v899_v63 = vmul.f32 1.442695, %v891_v61  ;;  %v882_v0 = vpop.xlane.xlu1 %881 }
 0x36c   : > { %3412 = vpow2.f32 %v903_v62  ;;  %v894_v1 = vsub.f32 %v2961_v50, %v882_v0  ;;  %v878_v2 = vpop.xlane.xlu0 %877  ;;  %v955_v62 = vld [vmem:[%s4361_s16] sm:$0xff] }
 0x36d   : > { %v892_v3 = vsub.f32 %v847_v51, %v878_v2  ;;  %3414 = vpow2.f32 %v899_v63  ;;  %v956_v63 = vld [vmem:[%s4361_s16 + $0x8] sm:$0xff] }
 0x36e   : > { %v905_v6 = vmul.f32 1.442695, %v894_v1  ;;  %v957_v1 = vld [vmem:[%s4361_s16 + $0x10] sm:$0xff] }
 0x36f   : > { %v901_v7 = vmul.f32 1.442695, %v892_v3  ;;  %v4516_v15 = vpop.permute.xlu1 %1110 }
 0x370   : > { %3416 = vpow2.f32 %v905_v6  ;;  %v4499_v9 = vpop.permute.xlu0 %1108 }
 0x371   : > { %3166 = vmatprep.subr.msk.bf16.mxu0 %vm773_vm0, %v4499_v9  ;;  %3418 = vpow2.f32 %v901_v7 }
 0x376   : > { %v3413_v10 = vpop.eup %3412 }
 0x377   : > { %919 = vadd.xlane.f32.xlu0 %v3413_v10  ;;  %v4503_v11 = vpop.eup %3414 }
 0x37a   : > { %v4505_v12 = vpop.eup %3416 }
 0x37b   : > { %915 = vadd.xlane.f32.xlu0 %v4503_v11  ;;  %921 = vadd.xlane.f32.xlu1 %v4505_v12  ;;  %v4509_v13 = vpop.eup %3418 }
 0x37f   : > { %917 = vadd.xlane.f32.xlu1 %v4509_v13 }
 0x390   : > { %1116 = vrot.lane.b32.xlu1 %v4406_v19, %s3901_s14 }
 0x391   : > { %1118 = vrot.lane.b32.xlu0 %v4415_v24, %s3901_s14 }
 0x3a0   : > { %v890_v16 = vpop.xlane.xlu1 %889 }
 0x3a1   : > { %v888_v17 = vpop.xlane.xlu0 %887  ;;  %v898_v29 = vsub.f32 %v2965_v54, %v890_v16 }
 0x3a2   : > { %v897_v18 = vsub.f32 %v2964_v52, %v888_v17 }
 0x3a3   : > { %v913_v31 = vmul.f32 1.442695, %v898_v29 }
 0x3a4   : > { %v911_v20 = vmul.f32 1.442695, %v897_v18  ;;  %v886_v21 = vpop.xlane.xlu1 %885 }
 0x3a5   : > { %v896_v22 = vsub.f32 %v863_v55, %v886_v21  ;;  %v884_v23 = vpop.xlane.xlu0 %883 }
 0x3a6   : > { %v895_v25 = vsub.f32 %v860_v53, %v884_v23  ;;  %3420 = vpow2.f32 %v911_v20 }
 0x3a7   : > { %v909_v27 = vmul.f32 1.442695, %v896_v22 }
 0x3a8   : > { %v907_v30 = vmul.f32 1.442695, %v895_v25  ;;  %v1113_v40 = vpop.permute.xlu1 %1112 }
 0x3a9   : > { %3422 = vpow2.f32 %v909_v27  ;;  %v1115_v38 = vpop.permute.xlu0 %1114 }
 0x3aa   : > { %3424 = vpow2.f32 %v907_v30  ;;  %v1146_v17 = vsel %vm773_vm0, %v1115_v38, 0 }
 0x3ab   : > { %3426 = vpow2.f32 %v913_v31 }
 0x3b0   : > { %v4518_v32 = vpop.eup %3420 }
 0x3b3   : > { %v4520_v34 = vpop.eup %3422 }
 0x3b4   : > { %927 = vadd.xlane.f32.xlu1 %v4518_v32  ;;  %925 = vadd.xlane.f32.xlu0 %v4520_v34  ;;  %v4524_v36 = vpop.eup %3424 }
 0x3b5   : > { %v4527_v37 = vpop.eup %3426 }
 0x3b8   : > { %923 = vadd.xlane.f32.xlu1 %v4524_v36 }
 0x3bc   : > { %929 = vadd.xlane.f32.xlu1 %v4527_v37 }
 0x3ca   : > { %1120 = vrot.lane.b32.xlu0 %v4422_v26, %s3901_s14 }
 0x3cd   : > { %1122 = vrot.lane.b32.xlu1 %v4429_v28, %s3901_s14 }
 0x3ce   : > { %1100 = vrot.lane.b32.xlu0 %v4437_v35, %s3901_s14 }
 0x3d1   : > { %1102 = vrot.lane.b32.xlu1 %v4435_v33, %s3901_s14 }
 0x3d2   : > { %1104 = vrot.lane.b32.xlu0 %v4445_v41, %s3901_s14 }
 0x3d5   : > { %1106 = vrot.lane.b32.xlu1 %v4443_v39, %s3901_s14 }
 0x3d6   : > { %1327 = vrot.lane.b32.xlu0 %v4452_v42, %s3901_s14 }
 0x3d9   : > { %1329 = vrot.lane.b32.xlu1 %v4455_v43, %s3901_s14 }
 0x3da   : > { %1331 = vrot.lane.b32.xlu0 %v4462_v44, %s3901_s14 }
 0x3dd   : > { %1333 = vrot.lane.b32.xlu1 %v4465_v45, %s3901_s14 }
 0x3de   : > { %1339 = vrot.lane.b32.xlu0 %v4482_v56, %s3901_s14 }
 0x3e1   : > { %1335 = vrot.lane.b32.xlu1 %v4471_v46, %s3901_s14 }
 0x3e5   : > { %1337 = vrot.lane.b32.xlu1 %v4476_v47, %s3901_s14 }
 0x404   : > { %v920_v48 = vpop.xlane.xlu0 %919 }
 0x405   : > { %3428 = vrcp.f32 %v920_v48 }
 0x408   : > { %v916_v49 = vpop.xlane.xlu0 %915  ;;  %v922_v50 = vpop.xlane.xlu1 %921 }
 0x409   : > { %3430 = vrcp.f32 %v916_v49 }
 0x40a   : > { %3432 = vrcp.f32 %v922_v50  ;;  %v959_v50 = vld [vmem:[%s4361_s16 + $0x20] sm:$0xff] }
 0x40c   : > { %v918_v51 = vpop.xlane.xlu1 %917 }
 0x40d   : > { %3434 = vrcp.f32 %v918_v51  ;;  %v960_v51 = vld [vmem:[%s4361_s16 + $0x28] sm:$0xff] }
 0x40f   : > { %v3429_v52 = vpop.eup %3428 }
 0x410   : > { %v941_v53 = vmul.f32 %v3429_v52, %v3413_v10  ;;  %v1117_v18 = vpop.permute.xlu1 %1116 }
 0x411   : > { %v1149_v20 = vsel %vm773_vm0, %v1117_v18, 0 }
 0x412   : > { %949 = vst [vmem:[%s4557_s30 + $0x10] sm:$0xff] %v941_v53  ;;  %v965_v7 = vmul.f32 %v957_v1, %v941_v53 }
 0x413   : > { %v3431_v54 = vpop.eup %3430 }
 0x414   : > { %v3433_v55 = vpop.eup %3432  ;;  %v939_v58 = vmul.f32 %v3431_v54, %v4503_v11  ;;  %v1137_v11 = vsel %vm773_vm0, %v4499_v9, 0  ;;  %v1119_v9 = vpop.permute.xlu0 %1118 }
 0x415   : > { %v942_v59 = vmul.f32 %v3433_v55, %v4505_v12  ;;  %v1140_v12 = vsel %vm773_vm0, %v4516_v15, 0  ;;  %v1152_v23 = vsel %vm773_vm0, %v1119_v9, 0 }
 0x416   : > { %947 = vst [vmem:[%s4557_s30] sm:$0xff] %v939_v58  ;;  %v963_v3 = vmul.f32 %v955_v62, %v939_v58  ;;  %v962_v58 = vld [vmem:[%s4361_s16 + $0x38] sm:$0xff] }
 0x417   : > { %v3435_v61 = vpop.eup %3434  ;;  %950 = vst [vmem:[%s4557_s30 + $0x18] sm:$0xff] %v942_v59  ;;  %v966_v2 = vmul.f32 %v958_v60, %v942_v59 }
 0x418   : > { %v940_v0 = vmul.f32 %v3435_v61, %v4509_v13  ;;  %v1143_v13 = vsel %vm773_vm0, %v1113_v40, 0 }
 0x419   : > { %v972_v16 = vpack.c.bf16 %v966_v2, %v965_v7 }
 0x41a   : > { %948 = vst [vmem:[%s4557_s30 + $0x8] sm:$0xff] %v940_v0  ;;  %v964_v6 = vmul.f32 %v956_v63, %v940_v0 }
 0x41c   : > { %v971_v10 = vpack.c.bf16 %v964_v6, %v963_v3 }
 0x41e   : > { %2982 = vmatprep.mubr.bf16.mxu0 %v971_v10 }
 0x41f   : > { %2983 = vmatmul.mubr.bf16.vlgmr.msra.gmra.mrb[8].mxu0 %v972_v16 }
 0x420   : > { %2991 = vmatpush3.bf16.xpose.msra.mxu0 %v1137_v11 }
 0x421   : > { %3167 = vmatprep.subr.msk.bf16.mxu0 %vm773_vm0, %v4516_v15 }
 0x428   : > { %2993 = vmatpush3.bf16.xpose.msra.mxu0 %v1140_v12 }
 0x429   : > { %3168 = vmatprep.subr.msk.bf16.mxu0 %vm773_vm0, %v1113_v40 }
 0x430   : > { %2995 = vmatpush3.bf16.xpose.msra.mxu0 %v1143_v13 }
 0x431   : > { %3169 = vmatprep.subr.msk.bf16.mxu0 %vm773_vm0, %v1115_v38 }
 0x438   : > { %2997 = vmatpush3.bf16.xpose.msra.mxu0 %v1146_v17 }
 0x439   : > { %3170 = vmatprep.subr.msk.bf16.mxu0 %vm773_vm0, %v1117_v18 }
 0x440   : > { %2999 = vmatpush3.bf16.xpose.msra.mxu0 %v1149_v20 }
 0x441   : > { %3171 = vmatprep.subr.msk.bf16.mxu0 %vm773_vm0, %v1119_v9  ;;  %v926_v15 = vpop.xlane.xlu0 %925  ;;  %v928_v21 = vpop.xlane.xlu1 %927 }
 0x442   : > { %3436 = vrcp.f32 %v926_v15 }
 0x443   : > { %3438 = vrcp.f32 %v928_v21 }
 0x445   : > { %v924_v22 = vpop.xlane.xlu1 %923  ;;  %v1121_v25 = vpop.permute.xlu0 %1120 }
 0x446   : > { %3440 = vrcp.f32 %v924_v22  ;;  %v1155_v31 = vsel %vm773_vm0, %v1121_v25, 0 }
 0x448   : > { %3001 = vmatpush3.bf16.xpose.msra.mxu0 %v1152_v23 }
 0x449   : > { %v930_v27 = vpop.xlane.xlu1 %929  ;;  %3172 = vmatprep.subr.msk.bf16.mxu0 %vm773_vm0, %v1121_v25 }
 0x44a   : > { %3442 = vrcp.f32 %v930_v27 }
 0x44c   : > { %v3437_v29 = vpop.eup %3436 }
 0x44d   : > { %v3439_v30 = vpop.eup %3438  ;;  %v944_v38 = vmul.f32 %v3437_v29, %v4520_v34  ;;  %v1123_v49 = vpop.permute.xlu1 %1122  ;;  %v961_v34 = vld [vmem:[%s4361_s16 + $0x30] sm:$0xff] }
 0x44e   : > { %v945_v40 = vmul.f32 %v3439_v30, %v4518_v32  ;;  %v1158_v60 = vsel %vm773_vm0, %v1123_v49, 0 }
 0x44f   : > { %952 = vst [vmem:[%s4557_s30 + $0x28] sm:$0xff] %v944_v38  ;;  %v968_v54 = vmul.f32 %v960_v51, %v944_v38 }
 0x450   : > { %v3441_v48 = vpop.eup %3440  ;;  %3003 = vmatpush3.bf16.xpose.msra.mxu0 %v1155_v31  ;;  %953 = vst [vmem:[%s4557_s30 + $0x30] sm:$0xff] %v945_v40  ;;  %v969_v61 = vmul.f32 %v961_v34, %v945_v40 }
 0x451   : > { %v943_v52 = vmul.f32 %v3441_v48, %v4524_v36  ;;  %3173 = vmatprep.subr.msk.bf16.mxu0 %vm773_vm0, %v1123_v49  ;;  %v1101_v36 = vpop.permute.xlu0 %1100  ;;  %v1103_v0 = vpop.permute.xlu1 %1102 }
 0x453   : > { %951 = vst [vmem:[%s4557_s30 + $0x20] sm:$0xff] %v943_v52  ;;  %v967_v53 = vmul.f32 %v959_v50, %v943_v52 }
 0x454   : > { %v3443_v55 = vpop.eup %3442 }
 0x455   : > { %v973_v59 = vpack.c.bf16 %v968_v54, %v967_v53  ;;  %v946_v32 = vmul.f32 %v3443_v55, %v4527_v37  ;;  %v1105_v1 = vpop.permute.xlu0 %1104  ;;  %v1107_v2 = vpop.permute.xlu1 %1106 }
 0x457   : > { %2986 = vmatprep.mubr.bf16.mxu0 %v973_v59  ;;  %954 = vst [vmem:[%s4557_s30 + $0x38] sm:$0xff] %v946_v32  ;;  %v970_v62 = vmul.f32 %v962_v58, %v946_v32 }
 0x458   : > { %3005 = vmatpush3.bf16.xpose.msra.mxu0 %v1158_v60 }
 0x459   : > { %v974_v63 = vpack.c.bf16 %v970_v62, %v969_v61  ;;  %v1328_v37 = vpop.permute.xlu0 %1327  ;;  %v1330_v10 = vpop.permute.xlu1 %1329 }
 0x45a   : > { %3014 = vmatprep.subr.bf16.mxu1 %v1328_v37 }
 0x45b   : > { %2987 = vmatmul.mubr.bf16.gmra.mrb[12].mxu0 %v974_v63  ;;  %3015 = vmatpush3.bf16.msra.mxu1 %v1328_v37 }
 0x45c   : > { %3006 = vmatprep.mubr.msk.bf16.mxu0 %vm773_vm0, %v1101_v36  ;;  %3016 = vmatprep.subr.bf16.mxu1 %v1330_v10 }
 0x45d   : > { %v1332_v13 = vpop.permute.xlu0 %1331  ;;  %v1334_v17 = vpop.permute.xlu1 %1333 }
 0x45f   : > { %3017 = vmatpush3.bf16.msra.mxu1 %v1330_v10 }
 0x460   : > { %3018 = vmatprep.subr.bf16.mxu1 %v1332_v13 }
 0x461   : > { %v1336_v18 = vpop.permute.xlu1 %1335  ;;  %v1340_v20 = vpop.permute.xlu0 %1339 }
 0x463   : > { %3007 = vmatmul.mubr.msk.bf16.vlgmr.msra.gmra.mrb[16].mxu0 %vm773_vm0, %v1103_v0  ;;  %3019 = vmatpush3.bf16.msra.mxu1 %v1332_v13 }
 0x464   : > { %3010 = vmatprep.mubr.msk.bf16.mxu0 %vm773_vm0, %v1105_v1  ;;  %3020 = vmatprep.subr.bf16.mxu1 %v1334_v17 }
 0x465   : > { %v1338_v9 = vpop.permute.xlu1 %1337 }
 0x467   : > { %3021 = vmatpush3.bf16.msra.mxu1 %v1334_v17 }
 0x468   : > { %3022 = vmatprep.subr.bf16.mxu1 %v1336_v18 }
 0x46b   : > { %3011 = vmatmul.mubr.msk.bf16.gmra.mrb[20].mxu0 %vm773_vm0, %v1107_v2  ;;  %3023 = vmatpush3.bf16.msra.mxu1 %v1336_v18 }
 0x46c   : > { %3024 = vmatprep.subr.bf16.mxu1 %v1338_v9 }
 0x46f   : > { %3025 = vmatpush3.bf16.msra.mxu1 %v1338_v9 }
 0x470   : > { %3026 = vmatprep.subr.bf16.mxu1 %v1340_v20 }
 0x473   : > { %3027 = vmatpush3.bf16.msra.mxu1 %v1340_v20  ;;  %v2728_v20 = vld [vmem:[%s4361_s16 + $0x48] sm:$0xff] }
 0x4f2   : > { %v2984_v3 = vpop.f32.mrb[8].mxu0 }
 0x4f3   : > { %v1057_v6 = vpop.f32.mrb[9].mxu0 }
 0x4f4   : > { %v2985_v7 = vpop.f32.mrb[10].mxu0 }
 0x4f5   : > { %v1089_v16 = vpack.c.bf16 %v2985_v7, %v2984_v3  ;;  %v1060_v11 = vpop.f32.mrb[11].mxu0 }
 0x4f6   : > { %v1088_v12 = vpack.c.bf16 %v1060_v11, %v1057_v6 }
 0x4f7   : > { %1093 = vst.msk [vmem:[#allocation2 + $0x8] sm:$0xff] %vm773_vm0, %v1089_v16 }
 0x4f8   : > { %1092 = vst.msk [vmem:[#allocation2] sm:$0xff] %vm773_vm0, %v1088_v12 }
 0x52e   : > { %v2988_v15 = vpop.f32.mrb[12].mxu0 }
 0x52f   : > { %v1073_v21 = vpop.f32.mrb[13].mxu0 }
 0x530   : > { %v2989_v22 = vpop.f32.mrb[14].mxu0 }
 0x531   : > { %v1091_v23 = vpack.c.bf16 %v2989_v22, %v2988_v15  ;;  %v1076_v25 = vpop.f32.mrb[15].mxu0  ;;  %v2727_v22 = vld [vmem:[%s4361_s16 + $0x40] sm:$0xff] }
 0x532   : > { %v1090_v27 = vpack.c.bf16 %v1076_v25, %v1073_v21 }
 0x533   : > { %1095 = vst.msk [vmem:[#allocation2 + $0x18] sm:$0xff] %vm773_vm0, %v1091_v23 }
 0x534   : > { %1094 = vst.msk [vmem:[#allocation2 + $0x10] sm:$0xff] %vm773_vm0, %v1090_v27 }
 0x536   : > { %v3008_v29 = vpop.f32.mrb[16].mxu0 }
 0x537   : > { %1229 = vmax.xlane.f32.xlu0 %v3008_v29  ;;  %v1194_v30 = vpop.f32.mrb[17].mxu0 }
 0x538   : > { %v3009_v31 = vpop.f32.mrb[18].mxu0 }
 0x539   : > { %v1197_v38 = vpop.f32.mrb[19].mxu0 }
 0x53a   : > { %1227 = vmax.xlane.f32.xlu1 %v1197_v38 }
 0x53b   : > { %1225 = vmax.xlane.f32.xlu0 %v1194_v30 }
 0x53e   : > { %v3012_v40 = vpop.f32.mrb[20].mxu0 }
 0x53f   : > { %1231 = vmax.xlane.f32.xlu0 %v3009_v31  ;;  %v1210_v48 = vpop.f32.mrb[21].mxu0 }
 0x540   : > { %v3013_v49 = vpop.f32.mrb[22].mxu0 }
 0x541   : > { %v1213_v50 = vpop.f32.mrb[23].mxu0 }
 0x54b   : > { %1341 = vrot.lane.b32.xlu1 %v4487_v57, %s3901_s14 }
 0x555   : > { %1449 = vrot.lane.b32.xlu0 %v4376_v4, %s3902_s28 }
 0x56f   : > { %1239 = vmax.xlane.f32.xlu1 %v3013_v49 }
 0x573   : > { %1235 = vmax.xlane.f32.xlu1 %v1213_v50 }
 0x574   : > { %1237 = vmax.xlane.f32.xlu0 %v3012_v40 }
 0x578   : > { %1233 = vmax.xlane.f32.xlu0 %v1210_v48 }
 0x584   : > { %1451 = vrot.lane.b32.xlu1 %v4379_v5, %s3902_s28 }
 0x58e   : > { %1453 = vrot.lane.b32.xlu0 %v4388_v8, %s3902_s28 }
 0x592   : > { %1455 = vrot.lane.b32.xlu0 %v4397_v14, %s3902_s28 }
 0x5c4   : > { %v1230_v51 = vpop.xlane.xlu0 %1229 }
 0x5c5   : > { %v1243_v52 = vsub.f32 %v3008_v29, %v1230_v51 }
 0x5c7   : > { %v1253_v53 = vmul.f32 1.442695, %v1243_v52  ;;  %v1228_v54 = vpop.xlane.xlu1 %1227 }
 0x5c8   : > { %v1242_v55 = vsub.f32 %v1197_v38, %v1228_v54  ;;  %v1226_v34 = vpop.xlane.xlu0 %1225 }
 0x5c9   : > { %3444 = vpow2.f32 %v1253_v53  ;;  %v1241_v4 = vsub.f32 %v1194_v30, %v1226_v34  ;;  %v2729_v30 = vld [vmem:[%s4361_s16 + $0x50] sm:$0xff] }
 0x5ca   : > { %v1251_v58 = vmul.f32 1.442695, %v1242_v55 }
 0x5cb   : > { %v1249_v59 = vmul.f32 1.442695, %v1241_v4  ;;  %v1342_v32 = vpop.permute.xlu1 %1341 }
 0x5cc   : > { %3446 = vpow2.f32 %v1251_v58  ;;  %v1232_v60 = vpop.xlane.xlu0 %1231  ;;  %3028 = vmatprep.subr.bf16.mxu1 %v1342_v32 }
 0x5cd   : > { %3448 = vpow2.f32 %v1249_v59  ;;  %v1244_v5 = vsub.f32 %v3009_v31, %v1232_v60  ;;  %3029 = vmatpush3.bf16.msra.mxu1 %v1342_v32  ;;  %v2730_v31 = vld [vmem:[%s4361_s16 + $0x58] sm:$0xff] }
 0x5cf   : > { %v1255_v8 = vmul.f32 1.442695, %v1244_v5 }
 0x5d0   : > { %v4618_v61 = vpop.permute.xlu0 %1449 }
 0x5d1   : > { %3450 = vpow2.f32 %v1255_v8  ;;  %3174 = vmatprep.subr.msk.bf16.mxu1 %vm773_vm0, %v4618_v61  ;;  %v1478_v51 = vsel %vm773_vm0, %v4618_v61, 0 }
 0x5d3   : > { %v3445_v14 = vpop.eup %3444 }
 0x5d4   : > { %1269 = vadd.xlane.f32.xlu0 %v3445_v14 }
 0x5d6   : > { %v3447_v62 = vpop.eup %3446 }
 0x5d7   : > { %v4622_v63 = vpop.eup %3448 }
 0x5d8   : > { %1265 = vadd.xlane.f32.xlu1 %v4622_v63  ;;  %1267 = vadd.xlane.f32.xlu0 %v3447_v62 }
 0x5db   : > { %v4625_v36 = vpop.eup %3450 }
 0x5dc   : > { %1271 = vadd.xlane.f32.xlu1 %v4625_v36 }
 0x5ed   : > { %1457 = vrot.lane.b32.xlu1 %v4406_v19, %s3902_s28 }
 0x5ee   : > { %1459 = vrot.lane.b32.xlu0 %v4415_v24, %s3902_s28 }
 0x5fc   : > { %v1240_v0 = vpop.xlane.xlu1 %1239 }
 0x5fd   : > { %v1248_v16 = vsub.f32 %v3013_v49, %v1240_v0 }
 0x5ff   : > { %v1263_v13 = vmul.f32 1.442695, %v1248_v16 }
 0x600   : > { %v1236_v1 = vpop.xlane.xlu1 %1235 }
 0x601   : > { %v1246_v2 = vsub.f32 %v1213_v50, %v1236_v1  ;;  %v1238_v37 = vpop.xlane.xlu0 %1237 }
 0x602   : > { %v1247_v3 = vsub.f32 %v3012_v40, %v1238_v37  ;;  %v2732_v37 = vld [vmem:[%s4361_s16 + $0x68] sm:$0xff] }
 0x603   : > { %v1259_v6 = vmul.f32 1.442695, %v1246_v2  ;;  %v2731_v2 = vld [vmem:[%s4361_s16 + $0x60] sm:$0xff] }
 0x604   : > { %v1261_v7 = vmul.f32 1.442695, %v1247_v3 }
 0x605   : > { %3452 = vpow2.f32 %v1259_v6  ;;  %v1234_v10 = vpop.xlane.xlu0 %1233 }
 0x606   : > { %3454 = vpow2.f32 %v1261_v7  ;;  %v1245_v11 = vsub.f32 %v1210_v48, %v1234_v10 }
 0x608   : > { %v1257_v12 = vmul.f32 1.442695, %v1245_v11  ;;  %v2733_v11 = vld [vmem:[%s4361_s16 + $0x70] sm:$0xff] }
 0x60a   : > { %3456 = vpow2.f32 %v1257_v12  ;;  %v2734_v12 = vld [vmem:[%s4361_s16 + $0x78] sm:$0xff] }
 0x60b   : > { %3458 = vpow2.f32 %v1263_v13 }
 0x60f   : > { %v4632_v19 = vpop.eup %3452 }
 0x610   : > { %v4634_v17 = vpop.eup %3454  ;;  %1275 = vadd.xlane.f32.xlu0 %v4632_v19 }
 0x611   : > { %1277 = vadd.xlane.f32.xlu1 %v4634_v17 }
 0x614   : > { %v4638_v24 = vpop.eup %3456 }
 0x615   : > { %1273 = vadd.xlane.f32.xlu1 %v4638_v24  ;;  %v4641_v18 = vpop.eup %3458 }
 0x619   : > { %1279 = vadd.xlane.f32.xlu1 %v4641_v18 }
 0x626   : > { %1461 = vrot.lane.b32.xlu0 %v4422_v26, %s3902_s28  ;;  %v1454_v26 = vpop.permute.xlu0 %1453 }
 0x627   : > { %v1484_v53 = vsel %vm773_vm0, %v1454_v26, 0 }
 0x62a   : > { %1463 = vrot.lane.b32.xlu1 %v4429_v28, %s3902_s28  ;;  %1441 = vrot.lane.b32.xlu0 %v4437_v35, %s3902_s28  ;;  %v1456_v28 = vpop.permute.xlu0 %1455 }
 0x62b   : > { %v1487_v54 = vsel %vm773_vm0, %v1456_v28, 0 }
 0x62e   : > { %1443 = vrot.lane.b32.xlu1 %v4435_v33, %s3902_s28  ;;  %1445 = vrot.lane.b32.xlu0 %v4445_v41, %s3902_s28 }
 0x632   : > { %1447 = vrot.lane.b32.xlu1 %v4443_v39, %s3902_s28  ;;  %1668 = vrot.lane.b32.xlu0 %v4452_v42, %s3902_s28  ;;  %v1452_v42 = vpop.permute.xlu1 %1451 }
 0x633   : > { %v1481_v52 = vsel %vm773_vm0, %v1452_v42, 0 }
 0x636   : > { %1670 = vrot.lane.b32.xlu1 %v4455_v43, %s3902_s28  ;;  %1672 = vrot.lane.b32.xlu0 %v4462_v44, %s3902_s28 }
 0x63a   : > { %1674 = vrot.lane.b32.xlu1 %v4465_v45, %s3902_s28  ;;  %1680 = vrot.lane.b32.xlu0 %v4482_v56, %s3902_s28 }
 0x63e   : > { %1676 = vrot.lane.b32.xlu1 %v4471_v46, %s3902_s28 }
 0x642   : > { %1678 = vrot.lane.b32.xlu1 %v4476_v47, %s3902_s28 }
 0x661   : > { %v1270_v43 = vpop.xlane.xlu0 %1269 }
 0x662   : > { %3460 = vrcp.f32 %v1270_v43 }
 0x665   : > { %v1268_v44 = vpop.xlane.xlu0 %1267  ;;  %v1266_v45 = vpop.xlane.xlu1 %1265 }
 0x666   : > { %3462 = vrcp.f32 %v1268_v44 }
 0x667   : > { %3464 = vrcp.f32 %v1266_v45 }
 0x669   : > { %v1272_v56 = vpop.xlane.xlu1 %1271  ;;  %v1460_v34 = vpop.permute.xlu0 %1459 }
 0x66a   : > { %3466 = vrcp.f32 %v1272_v56  ;;  %v1493_v60 = vsel %vm773_vm0, %v1460_v34, 0 }
 0x66c   : > { %v3461_v46 = vpop.eup %3460 }
 0x66d   : > { %v1291_v9 = vmul.f32 %v3461_v46, %v3445_v14  ;;  %v1458_v55 = vpop.permute.xlu1 %1457 }
 0x66e   : > { %v1490_v4 = vsel %vm773_vm0, %v1458_v55, 0 }
 0x66f   : > { %2721 = vst [vmem:[%s4557_s30 + $0x50] sm:$0xff] %v1291_v9  ;;  %v1317_v48 = vmul.f32 %v2729_v30, %v1291_v9 }
 0x670   : > { %v3463_v47 = vpop.eup %3462 }
 0x671   : > { %v3465_v15 = vpop.eup %3464  ;;  %v1290_v21 = vmul.f32 %v3463_v47, %v3447_v62 }
 0x672   : > { %v1289_v23 = vmul.f32 %v3465_v15, %v4622_v63 }
 0x673   : > { %2720 = vst [vmem:[%s4557_s30 + $0x48] sm:$0xff] %v1290_v21  ;;  %v1316_v25 = vmul.f32 %v2728_v20, %v1290_v21 }
 0x674   : > { %v3467_v27 = vpop.eup %3466  ;;  %2719 = vst [vmem:[%s4557_s30 + $0x40] sm:$0xff] %v1289_v23  ;;  %v1315_v29 = vmul.f32 %v2727_v22, %v1289_v23 }
 0x675   : > { %v1292_v38 = vmul.f32 %v3467_v27, %v4625_v36 }
 0x676   : > { %v1323_v40 = vpack.c.bf16 %v1316_v25, %v1315_v29 }
 0x677   : > { %2722 = vst [vmem:[%s4557_s30 + $0x58] sm:$0xff] %v1292_v38  ;;  %v1318_v49 = vmul.f32 %v2730_v31, %v1292_v38 }
 0x678   : > { %3030 = vmatprep.mubr.bf16.mxu1 %v1323_v40 }
 0x679   : > { %v1324_v50 = vpack.c.bf16 %v1318_v49, %v1317_v48 }
 0x67b   : > { %3031 = vmatmul.mubr.bf16.vlgmr.msra.gmra.mrb[8].mxu1 %v1324_v50 }
 0x67c   : > { %3039 = vmatpush3.bf16.xpose.msra.mxu1 %v1478_v51 }
 0x67d   : > { %3175 = vmatprep.subr.msk.bf16.mxu1 %vm773_vm0, %v1452_v42 }
 0x684   : > { %3041 = vmatpush3.bf16.xpose.msra.mxu1 %v1481_v52 }
 0x685   : > { %3176 = vmatprep.subr.msk.bf16.mxu1 %vm773_vm0, %v1454_v26 }
 0x68c   : > { %3043 = vmatpush3.bf16.xpose.msra.mxu1 %v1484_v53 }
 0x68d   : > { %3177 = vmatprep.subr.msk.bf16.mxu1 %vm773_vm0, %v1456_v28 }
 0x694   : > { %3045 = vmatpush3.bf16.xpose.msra.mxu1 %v1487_v54 }
 0x695   : > { %3178 = vmatprep.subr.msk.bf16.mxu1 %vm773_vm0, %v1458_v55 }
 0x69c   : > { %3047 = vmatpush3.bf16.xpose.msra.mxu1 %v1490_v4  ;;  %v3556_v4 = vld [vmem:[%s4352_s23] sm:$0xff]  }
 0x69d   : > { %3179 = vmatprep.subr.msk.bf16.mxu1 %vm773_vm0, %v1460_v34  ;;  %v1276_v58 = vpop.xlane.xlu0 %1275 }
 0x69e   : > { %3468 = vrcp.f32 %v1276_v58  ;;  %v1278_v59 = vpop.xlane.xlu1 %1277  ;;  %v3557_v58 = vld [vmem:[%s4352_s23 + $0x8] sm:$0xff]  }
 0x69f   : > { %3470 = vrcp.f32 %v1278_v59  ;;  %v3558_v59 = vld [vmem:[%s4352_s23 + $0x10] sm:$0xff]  }
 0x6a1   : > { %v1462_v5 = vpop.permute.xlu0 %1461 }
 0x6a2   : > { %v1274_v32 = vpop.xlane.xlu1 %1273  ;;  %v1496_v62 = vsel %vm773_vm0, %v1462_v5, 0 }
 0x6a3   : > { %3472 = vrcp.f32 %v1274_v32  ;;  %v3559_v32 = vld [vmem:[%s4352_s23 + $0x18] sm:$0xff]  }
 0x6a4   : > { %3049 = vmatpush3.bf16.xpose.msra.mxu1 %v1493_v60 }
 0x6a5   : > { %3180 = vmatprep.subr.msk.bf16.mxu1 %vm773_vm0, %v1462_v5  ;;  %v1442_v42 = vpop.permute.xlu0 %1441 }
 0x6a6   : > { %v1280_v8 = vpop.xlane.xlu1 %1279 }
 0x6a7   : > { %3474 = vrcp.f32 %v1280_v8 }
 0x6a8   : > { %v3469_v61 = vpop.eup %3468 }
 0x6a9   : > { %v3471_v14 = vpop.eup %3470  ;;  %v1294_v63 = vmul.f32 %v3469_v61, %v4632_v19  ;;  %v1446_v43 = vpop.permute.xlu0 %1445 }
 0x6aa   : > { %v1295_v36 = vmul.f32 %v3471_v14, %v4634_v17  ;;  %v1464_v0 = vpop.permute.xlu1 %1463 }
 0x6ab   : > { %2724 = vst [vmem:[%s4557_s30 + $0x68] sm:$0xff] %v1294_v63  ;;  %v1320_v7 = vmul.f32 %v2732_v37, %v1294_v63  ;;  %v1499_v16 = vsel %vm773_vm0, %v1464_v0, 0 }
 0x6ac   : > { %3051 = vmatpush3.bf16.xpose.msra.mxu1 %v1496_v62  ;;  %2725 = vst [vmem:[%s4557_s30 + $0x70] sm:$0xff] %v1295_v36  ;;  %v1321_v17 = vmul.f32 %v2733_v11, %v1295_v36  ;;  %v3560_v11 = vld [vmem:[%s4352_s23 + $0x20] sm:$0xff]  }
 0x6ad   : > { %v3473_v1 = vpop.eup %3472  ;;  %3181 = vmatprep.subr.msk.bf16.mxu1 %vm773_vm0, %v1464_v0 }
 0x6ae   : > { %v1293_v3 = vmul.f32 %v3473_v1, %v4638_v24  ;;  %v1444_v24 = vpop.permute.xlu1 %1443 }
 0x6b0   : > { %2723 = vst [vmem:[%s4557_s30 + $0x60] sm:$0xff] %v1293_v3  ;;  %v1319_v6 = vmul.f32 %v2731_v2, %v1293_v3 }
 0x6b1   : > { %v3475_v10 = vpop.eup %3474 }
 0x6b2   : > { %v1325_v13 = vpack.c.bf16 %v1320_v7, %v1319_v6  ;;  %v1296_v19 = vmul.f32 %v3475_v10, %v4641_v18  ;;  %v1448_v44 = vpop.permute.xlu1 %1447  ;;  %v1669_v18 = vpop.permute.xlu0 %1668 }
 0x6b3   : > { %3062 = vmatprep.subr.bf16.mxu0 %v1669_v18 }
 0x6b4   : > { %3034 = vmatprep.mubr.bf16.mxu1 %v1325_v13  ;;  %2726 = vst [vmem:[%s4557_s30 + $0x78] sm:$0xff] %v1296_v19  ;;  %v1322_v26 = vmul.f32 %v2734_v12, %v1296_v19  ;;  %3053 = vmatpush3.bf16.xpose.msra.mxu1 %v1499_v16  ;;  %v3561_v12 = vld [vmem:[%s4352_s23 + $0x28] sm:$0xff]  }
 0x6b5   : > { %3063 = vmatpush3.bf16.msra.mxu0 %v1669_v18 }
 0x6b6   : > { %v1326_v28 = vpack.c.bf16 %v1322_v26, %v1321_v17  ;;  %v1671_v20 = vpop.permute.xlu1 %1670  ;;  %v1673_v21 = vpop.permute.xlu0 %1672 }
 0x6b7   : > { %3064 = vmatprep.subr.bf16.mxu0 %v1671_v20 }
 0x6b8   : > { %3035 = vmatmul.mubr.bf16.gmra.mrb[12].mxu1 %v1326_v28 }
 0x6b9   : > { %3054 = vmatprep.mubr.msk.bf16.mxu1 %vm773_vm0, %v1442_v42  ;;  %3065 = vmatpush3.bf16.msra.mxu0 %v1671_v20 }
 0x6ba   : > { %v1675_v22 = vpop.permute.xlu1 %1674  ;;  %3066 = vmatprep.subr.bf16.mxu0 %v1673_v21  ;;  %v1681_v27 = vpop.permute.xlu0 %1680 }
 0x6bd   : > { %3067 = vmatpush3.bf16.msra.mxu0 %v1673_v21 }
 0x6be   : > { %3068 = vmatprep.subr.bf16.mxu0 %v1675_v22  ;;  %v1677_v23 = vpop.permute.xlu1 %1676 }
 0x6c0   : > { %3055 = vmatmul.mubr.msk.bf16.vlgmr.msra.gmra.mrb[16].mxu1 %vm773_vm0, %v1444_v24 }
 0x6c1   : > { %3058 = vmatprep.mubr.msk.bf16.mxu1 %vm773_vm0, %v1446_v43  ;;  %3069 = vmatpush3.bf16.msra.mxu0 %v1675_v22 }
 0x6c2   : > { %3070 = vmatprep.subr.bf16.mxu0 %v1677_v23  ;;  %v1679_v25 = vpop.permute.xlu1 %1678 }
 0x6c5   : > { %3071 = vmatpush3.bf16.msra.mxu0 %v1677_v23 }
 0x6c6   : > { %3072 = vmatprep.subr.bf16.mxu0 %v1679_v25 }
 0x6c8   : > { %3059 = vmatmul.mubr.msk.bf16.gmra.mrb[20].mxu1 %vm773_vm0, %v1448_v44 }
 0x6c9   : > { %3073 = vmatpush3.bf16.msra.mxu0 %v1679_v25 }
 0x6ca   : > { %3074 = vmatprep.subr.bf16.mxu0 %v1681_v27 }
 0x6cd   : > { %3075 = vmatpush3.bf16.msra.mxu0 %v1681_v27 }
 0x74e   : > { %v4712_v45 = vpop.f32.mrb[8].mxu1 }
 0x74f   : > { %v4714_v56 = vpop.f32.mrb[9].mxu1 }
 0x750   : > { %v4716_v46 = vpop.f32.mrb[10].mxu1 }
 0x751   : > { %v1417_v9 = vpack.c.bf16 %v4716_v46, %v4712_v45  ;;  %v4720_v47 = vpop.f32.mrb[11].mxu1 }
 0x752   : > { %v1416_v15 = vpack.c.bf16 %v4720_v47, %v4714_v56 }
 0x78b   : > { %v4724_v29 = vpop.f32.mrb[12].mxu1 }
 0x78c   : > { %v4726_v30 = vpop.f32.mrb[13].mxu1 }
 0x78d   : > { %v4728_v31 = vpop.f32.mrb[14].mxu1 }
 0x78e   : > { %v1419_v38 = vpack.c.bf16 %v4728_v31, %v4724_v29  ;;  %v4732_v40 = vpop.f32.mrb[15].mxu1 }
 0x78f   : > { %v1418_v48 = vpack.c.bf16 %v4732_v40, %v4726_v30  ;;  %v3571_v30 = vld [vmem:[%s4359_s4 + $0x38] sm:$0xff]  }
 0x793   : > { %v3056_v49 = vpop.f32.mrb[16].mxu1 }
 0x794   : > { %1570 = vmax.xlane.f32.xlu0 %v3056_v49  ;;  %v1535_v50 = vpop.f32.mrb[17].mxu1 }
 0x795   : > { %v3057_v51 = vpop.f32.mrb[18].mxu1 }
 0x796   : > { %v1538_v52 = vpop.f32.mrb[19].mxu1 }
 0x797   : > { %1568 = vmax.xlane.f32.xlu1 %v1538_v52 }
 0x798   : > { %1566 = vmax.xlane.f32.xlu0 %v1535_v50 }
 0x79b   : > { %v3060_v53 = vpop.f32.mrb[20].mxu1 }
 0x79c   : > { %1572 = vmax.xlane.f32.xlu0 %v3057_v51  ;;  %v1551_v54 = vpop.f32.mrb[21].mxu1 }
 0x79d   : > { %v3061_v55 = vpop.f32.mrb[22].mxu1 }
 0x79e   : > { %v1554_v34 = vpop.f32.mrb[23].mxu1 }
 0x7a8   : > { %1682 = vrot.lane.b32.xlu1 %v4487_v57, %s3902_s28 }
 0x7b2   : > { %1790 = vrot.lane.b32.xlu0 %v3556_v4, %s3903_s10  ;;  %v2748_v4 = vld [vmem:[%s4361_s16 + $0x88] sm:$0xff] }
 0x7cc   : > { %1580 = vmax.xlane.f32.xlu1 %v3061_v55 }
 0x7d0   : > { %1576 = vmax.xlane.f32.xlu1 %v1554_v34 }
 0x7d1   : > { %1578 = vmax.xlane.f32.xlu0 %v3060_v53 }
 0x7d5   : > { %1574 = vmax.xlane.f32.xlu0 %v1551_v54 }
 0x7e1   : > { %1792 = vrot.lane.b32.xlu1 %v3557_v58, %s3903_s10 }
 0x7eb   : > { %1794 = vrot.lane.b32.xlu0 %v3558_v59, %s3903_s10 }
 0x7ef   : > { %1796 = vrot.lane.b32.xlu0 %v3559_v32, %s3903_s10  ;;  %v2747_v32 = vld [vmem:[%s4361_s16 + $0x80] sm:$0xff] }
 0x821   : > { %v1571_v60 = vpop.xlane.xlu0 %1570 }
 0x822   : > { %v1584_v5 = vsub.f32 %v3056_v49, %v1571_v60  ;;  %v3562_v49 = vld [vmem:[%s4352_s23 + $0x30] sm:$0xff]  }
 0x824   : > { %v1594_v57 = vmul.f32 1.442695, %v1584_v5  ;;  %v1569_v8 = vpop.xlane.xlu1 %1568 }
 0x825   : > { %v1583_v61 = vsub.f32 %v1538_v52, %v1569_v8  ;;  %v1567_v14 = vpop.xlane.xlu0 %1566  ;;  %v2749_v8 = vld [vmem:[%s4361_s16 + $0x90] sm:$0xff] }
 0x826   : > { %3476 = vpow2.f32 %v1594_v57  ;;  %v1582_v62 = vsub.f32 %v1535_v50, %v1567_v14  ;;  %v3563_v50 = vld [vmem:[%s4352_s23 + $0x38] sm:$0xff]   ;;  %s2401_s23 = sadd.s32 %s5247_s12, %s2797_s25 }
 0x827   : > { %v1592_v63 = vmul.f32 1.442695, %v1583_v61  ;;  %v2750_v61 = vld [vmem:[%s4361_s16 + $0x98] sm:$0xff]  ;;  %s2789_s27 = sshll.u32 %s2401_s23, 7 }
 0x828   : > { %v1590_v36 = vmul.f32 1.442695, %v1582_v62  ;;  %v1683_v0 = vpop.permute.xlu1 %1682 }
 0x829   : > { %3478 = vpow2.f32 %v1592_v63  ;;  %v1573_v1 = vpop.xlane.xlu0 %1572  ;;  %3076 = vmatprep.subr.bf16.mxu0 %v1683_v0 }
 0x82a   : > { %3480 = vpow2.f32 %v1590_v36  ;;  %v1585_v2 = vsub.f32 %v3057_v51, %v1573_v1  ;;  %3077 = vmatpush3.bf16.msra.mxu0 %v1683_v0 }
 0x82c   : > { %v1596_v37 = vmul.f32 1.442695, %v1585_v2 }
 0x82d   : > { %v4746_v3 = vpop.permute.xlu0 %1790 }
 0x82e   : > { %3482 = vpow2.f32 %v1596_v37  ;;  %3182 = vmatprep.subr.msk.bf16.mxu0 %vm773_vm0, %v4746_v3  ;;  %v1819_v2 = vsel %vm773_vm0, %v4746_v3, 0 }
 0x830   : > { %v3477_v6 = vpop.eup %3476 }
 0x831   : > { %1610 = vadd.xlane.f32.xlu0 %v3477_v6 }
 0x833   : > { %v3479_v7 = vpop.eup %3478 }
 0x834   : > { %v3481_v10 = vpop.eup %3480 }
 0x835   : > { %1606 = vadd.xlane.f32.xlu1 %v3481_v10  ;;  %1608 = vadd.xlane.f32.xlu0 %v3479_v7 }
 0x838   : > { %v4750_v16 = vpop.eup %3482 }
 0x839   : > { %1612 = vadd.xlane.f32.xlu1 %v4750_v16 }
 0x84a   : > { %1798 = vrot.lane.b32.xlu1 %v3560_v11, %s3903_s10 }
 0x84b   : > { %1800 = vrot.lane.b32.xlu0 %v3561_v12, %s3903_s10 }
 0x859   : > { %v1581_v13 = vpop.xlane.xlu1 %1580 }
 0x85a   : > { %v1589_v44 = vsub.f32 %v3061_v55, %v1581_v13 }
 0x85c   : > { %v1604_v21 = vmul.f32 1.442695, %v1589_v44 }
 0x85d   : > { %v1577_v19 = vpop.xlane.xlu1 %1576 }
 0x85e   : > { %v1587_v17 = vsub.f32 %v1554_v34, %v1577_v19  ;;  %v1579_v26 = vpop.xlane.xlu0 %1578 }
 0x85f   : > { %v1588_v28 = vsub.f32 %v3060_v53, %v1579_v26 }
 0x860   : > { %v1600_v42 = vmul.f32 1.442695, %v1587_v17 }
 0x861   : > { %v1602_v24 = vmul.f32 1.442695, %v1588_v28  ;;  %v1793_v53 = vpop.permute.xlu1 %1792 }
 0x862   : > { %3484 = vpow2.f32 %v1600_v42  ;;  %v1575_v43 = vpop.xlane.xlu0 %1574  ;;  %v1822_v37 = vsel %vm773_vm0, %v1793_v53, 0 }
 0x863   : > { %3486 = vpow2.f32 %v1602_v24  ;;  %v1586_v18 = vsub.f32 %v1551_v54, %v1575_v43 }
 0x865   : > { %v1598_v20 = vmul.f32 1.442695, %v1586_v18 }
 0x866   : > { %v1795_v51 = vpop.permute.xlu0 %1794 }
 0x867   : > { %3488 = vpow2.f32 %v1598_v20 }
 0x868   : > { %3490 = vpow2.f32 %v1604_v21  ;;  %v2751_v21 = vld [vmem:[%s4361_s16 + $0xa0] sm:$0xff] }
 0x86a   : > { %v1797_v52 = vpop.permute.xlu0 %1796 }
 0x86c   : > { %v4757_v22 = vpop.eup %3484 }
 0x86d   : > { %v4759_v23 = vpop.eup %3486  ;;  %1616 = vadd.xlane.f32.xlu0 %v4757_v22 }
 0x86e   : > { %1618 = vadd.xlane.f32.xlu1 %v4759_v23 }
 0x871   : > { %v4763_v25 = vpop.eup %3488 }
 0x872   : > { %1614 = vadd.xlane.f32.xlu1 %v4763_v25  ;;  %v4766_v27 = vpop.eup %3490 }
 0x876   : > { %1620 = vadd.xlane.f32.xlu1 %v4766_v27 }
 0x883   : > { %1802 = vrot.lane.b32.xlu0 %v3562_v49, %s3903_s10  ;;  %v2752_v49 = vld [vmem:[%s4361_s16 + $0xa8] sm:$0xff] }
 0x887   : > { %1804 = vrot.lane.b32.xlu1 %v3563_v50, %s3903_s10  ;;  %1782 = vrot.lane.b32.xlu0 %v4437_v35, %s3903_s10 }
 0x88b   : > { %1784 = vrot.lane.b32.xlu1 %v4435_v33, %s3903_s10  ;;  %1786 = vrot.lane.b32.xlu0 %v4445_v41, %s3903_s10 }
 0x88f   : > { %1788 = vrot.lane.b32.xlu1 %v4443_v39, %s3903_s10 }
 0x8be   : > { %v1611_v54 = vpop.xlane.xlu0 %1610 }
 0x8bf   : > { %3492 = vrcp.f32 %v1611_v54  ;;  %v2754_v54 = vld [vmem:[%s4361_s16 + $0xb8] sm:$0xff] }
 0x8c2   : > { %v1609_v55 = vpop.xlane.xlu0 %1608  ;;  %v1607_v35 = vpop.xlane.xlu1 %1606 }
 0x8c3   : > { %3494 = vrcp.f32 %v1609_v55 }
 0x8c4   : > { %3496 = vrcp.f32 %v1607_v35 }
 0x8c6   : > { %v1613_v33 = vpop.xlane.xlu1 %1612  ;;  %v1801_v3 = vpop.permute.xlu0 %1800 }
 0x8c7   : > { %3498 = vrcp.f32 %v1613_v33  ;;  %v1834_v19 = vsel %vm773_vm0, %v1801_v3, 0 }
 0x8c9   : > { %v3493_v41 = vpop.eup %3492 }
 0x8ca   : > { %v1632_v34 = vmul.f32 %v3493_v41, %v3477_v6  ;;  %v1825_v6 = vsel %vm773_vm0, %v1795_v51, 0 }
 0x8cc   : > { %2741 = vst [vmem:[%s4557_s30 + $0x90] sm:$0xff] %v1632_v34  ;;  %v1658_v36 = vmul.f32 %v2749_v8, %v1632_v34 }
 0x8cd   : > { %v3495_v39 = vpop.eup %3494 }
 0x8ce   : > { %v3497_v58 = vpop.eup %3496  ;;  %v1631_v59 = vmul.f32 %v3495_v39, %v3479_v7  ;;  %v1828_v7 = vsel %vm773_vm0, %v1797_v52, 0 }
 0x8cf   : > { %v1630_v60 = vmul.f32 %v3497_v58, %v3481_v10  ;;  %v1799_v10 = vpop.permute.xlu1 %1798 }
 0x8d0   : > { %2740 = vst [vmem:[%s4557_s30 + $0x88] sm:$0xff] %v1631_v59  ;;  %v1657_v5 = vmul.f32 %v2748_v4, %v1631_v59 }
 0x8d1   : > { %v3499_v57 = vpop.eup %3498  ;;  %2739 = vst [vmem:[%s4557_s30 + $0x80] sm:$0xff] %v1630_v60  ;;  %v1656_v14 = vmul.f32 %v2747_v32, %v1630_v60 }
 0x8d2   : > { %v1633_v62 = vmul.f32 %v3499_v57, %v4750_v16  ;;  %v1831_v16 = vsel %vm773_vm0, %v1799_v10, 0 }
 0x8d3   : > { %v1664_v63 = vpack.c.bf16 %v1657_v5, %v1656_v14 }
 0x8d4   : > { %2742 = vst [vmem:[%s4557_s30 + $0x98] sm:$0xff] %v1633_v62  ;;  %v1659_v0 = vmul.f32 %v2750_v61, %v1633_v62 }
 0x8d5   : > { %3078 = vmatprep.mubr.bf16.mxu0 %v1664_v63 }
 0x8d6   : > { %v1665_v1 = vpack.c.bf16 %v1659_v0, %v1658_v36 }
 0x8d8   : > { %3079 = vmatmul.mubr.bf16.vlgmr.msra.gmra.mrb[24].mxu0 %v1665_v1 }
 0x8d9   : > { %3087 = vmatpush3.bf16.xpose.msra.mxu0 %v1819_v2 }
 0x8da   : > { %3183 = vmatprep.subr.msk.bf16.mxu0 %vm773_vm0, %v1793_v53 }
 0x8e1   : > { %3089 = vmatpush3.bf16.xpose.msra.mxu0 %v1822_v37 }
 0x8e2   : > { %3184 = vmatprep.subr.msk.bf16.mxu0 %vm773_vm0, %v1795_v51 }
 0x8e9   : > { %3091 = vmatpush3.bf16.xpose.msra.mxu0 %v1825_v6 }
 0x8ea   : > { %3185 = vmatprep.subr.msk.bf16.mxu0 %vm773_vm0, %v1797_v52 }
 0x8f1   : > { %3093 = vmatpush3.bf16.xpose.msra.mxu0 %v1828_v7 }
 0x8f2   : > { %3186 = vmatprep.subr.msk.bf16.mxu0 %vm773_vm0, %v1799_v10 }
 0x8f9   : > { %3095 = vmatpush3.bf16.xpose.msra.mxu0 %v1831_v16  ;;  %v3564_v16 = vld [vmem:[%s4359_s4 + $0x8] sm:$0xff]  }
 0x8fa   : > { %3187 = vmatprep.subr.msk.bf16.mxu0 %vm773_vm0, %v1801_v3  ;;  %v1617_v11 = vpop.xlane.xlu0 %1616 }
 0x8fb   : > { %3500 = vrcp.f32 %v1617_v11  ;;  %v1619_v12 = vpop.xlane.xlu1 %1618  ;;  %v3565_v11 = vld [vmem:[%s4359_s4] sm:$0xff]  }
 0x8fc   : > { %3502 = vrcp.f32 %v1619_v12  ;;  %v3566_v12 = vld [vmem:[%s4359_s4 + $0x10] sm:$0xff]  }
 0x8fe   : > { %v1803_v17 = vpop.permute.xlu0 %1802 }
 0x8ff   : > { %v1615_v13 = vpop.xlane.xlu1 %1614  ;;  %v1837_v24 = vsel %vm773_vm0, %v1803_v17, 0 }
 0x900   : > { %3504 = vrcp.f32 %v1615_v13  ;;  %v3567_v13 = vld [vmem:[%s4359_s4 + $0x20] sm:$0xff]  }
 0x901   : > { %3097 = vmatpush3.bf16.xpose.msra.mxu0 %v1834_v19  ;;  %v3568_v19 = vld [vmem:[%s4359_s4 + $0x28] sm:$0xff]  }
 0x902   : > { %3188 = vmatprep.subr.msk.bf16.mxu0 %vm773_vm0, %v1803_v17  ;;  %v1783_v39 = vpop.permute.xlu0 %1782  ;;  %v3569_v17 = vld [vmem:[%s4359_s4 + $0x18] sm:$0xff]  }
 0x903   : > { %v1621_v26 = vpop.xlane.xlu1 %1620 }
 0x904   : > { %3506 = vrcp.f32 %v1621_v26 }
 0x905   : > { %v3501_v28 = vpop.eup %3500 }
 0x906   : > { %v3503_v42 = vpop.eup %3502  ;;  %v1635_v43 = vmul.f32 %v3501_v28, %v4757_v22  ;;  %v1787_v4 = vpop.permute.xlu0 %1786 }
 0x907   : > { %v1636_v44 = vmul.f32 %v3503_v42, %v4759_v23  ;;  %v1805_v18 = vpop.permute.xlu1 %1804  ;;  %v2753_v23 = vld [vmem:[%s4361_s16 + $0xb0] sm:$0xff] }
 0x908   : > { %2744 = vst [vmem:[%s4557_s30 + $0xa8] sm:$0xff] %v1635_v43  ;;  %v1661_v52 = vmul.f32 %v2752_v49, %v1635_v43  ;;  %v1840_v53 = vsel %vm773_vm0, %v1805_v18, 0 }
 0x909   : > { %3099 = vmatpush3.bf16.xpose.msra.mxu0 %v1837_v24  ;;  %2745 = vst [vmem:[%s4557_s30 + $0xb0] sm:$0xff] %v1636_v44  ;;  %v1662_v33 = vmul.f32 %v2753_v23, %v1636_v44 }
 0x90a   : > { %v3505_v20 = vpop.eup %3504  ;;  %3189 = vmatprep.subr.msk.bf16.mxu0 %vm773_vm0, %v1805_v18 }
 0x90b   : > { %v1634_v50 = vmul.f32 %v3505_v20, %v4763_v25  ;;  %v1785_v25 = vpop.permute.xlu1 %1784 }
 0x90d   : > { %2743 = vst [vmem:[%s4557_s30 + $0xa0] sm:$0xff] %v1634_v50  ;;  %v1660_v51 = vmul.f32 %v2751_v21, %v1634_v50 }
 0x90e   : > { %v3507_v22 = vpop.eup %3506 }
 0x90f   : > { %v1666_v55 = vpack.c.bf16 %v1661_v52, %v1660_v51  ;;  %v1637_v35 = vmul.f32 %v3507_v22, %v4766_v27  ;;  %v1789_v58 = vpop.permute.xlu1 %1788 }
 0x911   : > { %3082 = vmatprep.mubr.bf16.mxu0 %v1666_v55  ;;  %2746 = vst [vmem:[%s4557_s30 + $0xb8] sm:$0xff] %v1637_v35  ;;  %v1663_v41 = vmul.f32 %v2754_v54, %v1637_v35  ;;  %3101 = vmatpush3.bf16.xpose.msra.mxu0 %v1840_v53 }
 0x913   : > { %v1667_v34 = vpack.c.bf16 %v1663_v41, %v1662_v33 }
 0x915   : > { %3083 = vmatmul.mubr.bf16.gmra.mrb[28].mxu0 %v1667_v34 }
 0x916   : > { %3102 = vmatprep.mubr.msk.bf16.mxu0 %vm773_vm0, %v1783_v39 }
 0x91d   : > { %3103 = vmatmul.mubr.msk.bf16.vlgmr.msra.gmra.mrb[32].mxu0 %vm773_vm0, %v1785_v25 }
 0x91e   : > { %3106 = vmatprep.mubr.msk.bf16.mxu0 %vm773_vm0, %v1787_v4 }
 0x925   : > { %3107 = vmatmul.mubr.msk.bf16.gmra.mrb[36].mxu0 %vm773_vm0, %v1789_v58 }
 0x9ab   : > { %v4822_v27 = vpop.f32.mrb[24].mxu0 }
 0x9ac   : > { %v4824_v59 = vpop.f32.mrb[25].mxu0 }
 0x9ad   : > { %v4826_v32 = vpop.f32.mrb[26].mxu0 }
 0x9ae   : > { %v1758_v60 = vpack.c.bf16 %v4826_v32, %v4822_v27  ;;  %v4830_v5 = vpop.f32.mrb[27].mxu0 }
 0x9af   : > { %v1757_v57 = vpack.c.bf16 %v4830_v5, %v4824_v59 }
 0x9e8   : > { %v4834_v8 = vpop.f32.mrb[28].mxu0 }
 0x9e9   : > { %v4836_v61 = vpop.f32.mrb[29].mxu0 }
 0x9ea   : > { %v4838_v14 = vpop.f32.mrb[30].mxu0 }
 0x9eb   : > { %v1760_v62 = vpack.c.bf16 %v4838_v14, %v4834_v8  ;;  %v4842_v63 = vpop.f32.mrb[31].mxu0 }
 0x9ec   : > { %v1759_v36 = vpack.c.bf16 %v4842_v63, %v4836_v61 }
 0x9f0   : > { %v3104_v0 = vpop.f32.mrb[32].mxu0 }
 0x9f1   : > { %1911 = vmax.xlane.f32.xlu0 %v3104_v0  ;;  %v1876_v1 = vpop.f32.mrb[33].mxu0 }
 0x9f2   : > { %v3105_v2 = vpop.f32.mrb[34].mxu0 }
 0x9f3   : > { %v1879_v37 = vpop.f32.mrb[35].mxu0 }
 0x9f4   : > { %1909 = vmax.xlane.f32.xlu1 %v1879_v37 }
 0x9f5   : > { %1907 = vmax.xlane.f32.xlu0 %v1876_v1 }
 0x9f8   : > { %v3108_v6 = vpop.f32.mrb[36].mxu0 }
 0x9f9   : > { %1913 = vmax.xlane.f32.xlu0 %v3105_v2  ;;  %v1892_v7 = vpop.f32.mrb[37].mxu0 }
 0x9fa   : > { %v4846_v10 = vpop.f32.mrb[38].mxu0 }
 0x9fb   : > { %v4848_v3 = vpop.f32.mrb[39].mxu0 }
 0x9fd   : > { %1915 = vmax.xlane.f32.xlu0 %v1892_v7 }
 0xa01   : > { %1919 = vmax.xlane.f32.xlu0 %v3108_v6 }
 0xa05   : > { %2011 = vrot.lane.b32.xlu1 %v3564_v16, %s3903_s10 }
 0xa17   : > { %2009 = vrot.lane.b32.xlu0 %v3565_v11, %s3903_s10 }
 0xa1b   : > { %2013 = vrot.lane.b32.xlu0 %v3566_v12, %s3903_s10 }
 0xa1f   : > { %2017 = vrot.lane.b32.xlu0 %v3567_v13, %s3903_s10 }
 0xa23   : > { %2019 = vrot.lane.b32.xlu0 %v3568_v19, %s3903_s10 }
 0xa29   : > { %1921 = vmax.xlane.f32.xlu1 %v4846_v10 }
 0xa2d   : > { %1917 = vmax.xlane.f32.xlu1 %v4848_v3 }
 0xa3e   : > { %2015 = vrot.lane.b32.xlu1 %v3569_v17, %s3903_s10  ;;  %v2767_v17 = vld [vmem:[%s4361_s16 + $0xc0] sm:$0xff] }
 0xa7e   : > { %v1912_v26 = vpop.xlane.xlu0 %1911 }
 0xa7f   : > { %v1925_v28 = vsub.f32 %v3104_v0, %v1912_v26  ;;  %v2768_v26 = vld [vmem:[%s4361_s16 + $0xc8] sm:$0xff] }
 0xa81   : > { %v1935_v42 = vmul.f32 1.442695, %v1925_v28  ;;  %v1910_v43 = vpop.xlane.xlu1 %1909 }
 0xa82   : > { %v1908_v24 = vpop.xlane.xlu0 %1907  ;;  %v1924_v20 = vsub.f32 %v1879_v37, %v1910_v43 }
 0xa83   : > { %3508 = vpow2.f32 %v1935_v42  ;;  %v1923_v44 = vsub.f32 %v1876_v1, %v1908_v24  ;;  %v3570_v1 = vld [vmem:[%s4359_s4 + $0x30] sm:$0xff]  }
 0xa84   : > { %v1933_v51 = vmul.f32 1.442695, %v1924_v20 }
 0xa85   : > { %v1931_v18 = vmul.f32 1.442695, %v1923_v44  ;;  %v2012_v34 = vpop.permute.xlu1 %2011 }
 0xa86   : > { %v1914_v21 = vpop.xlane.xlu0 %1913 }
 0xa87   : > { %3510 = vpow2.f32 %v1931_v18  ;;  %v1926_v49 = vsub.f32 %v3105_v2, %v1914_v21 }
 0xa89   : > { %v1937_v50 = vmul.f32 1.442695, %v1926_v49 }
 0xa8a   : > { %v1916_v52 = vpop.xlane.xlu0 %1915 }
 0xa8b   : > { %3512 = vpow2.f32 %v1937_v50  ;;  %v1927_v22 = vsub.f32 %v1892_v7, %v1916_v52  ;;  %v2770_v50 = vld [vmem:[%s4361_s16 + $0xd8] sm:$0xff]  ;;  %v2769_v52 = vld [vmem:[%s4361_s16 + $0xd0] sm:$0xff] }
 0xa8c   : > { %3514 = vpow2.f32 %v1933_v51 }
 0xa8d   : > { %v4864_v53 = vpop.eup %3508  ;;  %v1939_v23 = vmul.f32 1.442695, %v1927_v22 }
 0xa8e   : > { %v1920_v54 = vpop.xlane.xlu0 %1919  ;;  %1951 = vadd.xlane.f32.xlu1 %v4864_v53 }
 0xa8f   : > { %3516 = vpow2.f32 %v1939_v23  ;;  %v1929_v55 = vsub.f32 %v3108_v6, %v1920_v54 }
 0xa91   : > { %v4867_v35 = vpop.eup %3510  ;;  %v1943_v33 = vmul.f32 1.442695, %v1929_v55 }
 0xa92   : > { %1947 = vadd.xlane.f32.xlu0 %v4867_v35  ;;  %v2010_v41 = vpop.permute.xlu0 %2009 }
 0xa93   : > { %3518 = vpow2.f32 %v1943_v33  ;;  %3110 = vmatprep.subr.bf16.mxu1 %v2010_v41 }
 0xa94   : > { %3111 = vmatpush3.bf16.msra.mxu1 %v2010_v41  ;;  %v2774_v41 = vld [vmem:[%s4361_s16 + $0xf8] sm:$0xff] }
 0xa95   : > { %v4870_v39 = vpop.eup %3512  ;;  %3112 = vmatprep.subr.bf16.mxu1 %v2012_v34 }
 0xa96   : > { %1953 = vadd.xlane.f32.xlu1 %v4870_v39  ;;  %v2014_v25 = vpop.permute.xlu0 %2013  ;;  %v4873_v4 = vpop.eup %3514 }
 0xa98   : > { %3113 = vmatpush3.bf16.msra.mxu1 %v2012_v34 }
 0xa99   : > { %v4875_v58 = vpop.eup %3516  ;;  %3114 = vmatprep.subr.bf16.mxu1 %v2014_v25 }
 0xa9a   : > { %1955 = vadd.xlane.f32.xlu0 %v4875_v58  ;;  %1949 = vadd.xlane.f32.xlu1 %v4873_v4  ;;  %v2018_v56 = vpop.permute.xlu0 %2017 }
 0xa9c   : > { %3115 = vmatpush3.bf16.msra.mxu1 %v2014_v25  ;;  %v2772_v25 = vld [vmem:[%s4361_s16 + $0xe8] sm:$0xff] }
 0xa9d   : > { %v4879_v0 = vpop.eup %3518 }
 0xa9e   : > { %1959 = vadd.xlane.f32.xlu1 %v4879_v0  ;;  %v2020_v59 = vpop.permute.xlu0 %2019 }
 0xab0   : > { %2021 = vrot.lane.b32.xlu0 %v3570_v1, %s3903_s10 }
 0xab4   : > { %1424 = vrot.lane.b32.xlu0 %v1416_v15, %s3903_s10 }
 0xab6   : > { %v1922_v2 = vpop.xlane.xlu1 %1921 }
 0xab7   : > { %v1930_v37 = vsub.f32 %v4846_v10, %v1922_v2 }
 0xab8   : > { %1765 = vrot.lane.b32.xlu0 %v1757_v57, %s3902_s28 }
 0xab9   : > { %v1945_v6 = vmul.f32 1.442695, %v1930_v37 }
 0xaba   : > { %v1918_v7 = vpop.xlane.xlu1 %1917 }
 0xabb   : > { %3520 = vpow2.f32 %v1945_v6  ;;  %v1928_v16 = vsub.f32 %v4848_v3, %v1918_v7 }
 0xabc   : > { %1428 = vrot.lane.b32.xlu0 %v1418_v48, %s3903_s10 }
 0xabd   : > { %v1941_v47 = vmul.f32 1.442695, %v1928_v16 }
 0xabe   : > { %v2016_v15 = vpop.permute.xlu1 %2015 }
 0xabf   : > { %3522 = vpow2.f32 %v1941_v47  ;;  %3116 = vmatprep.subr.bf16.mxu1 %v2016_v15  ;;  %v3404_v47 = vld [vmem:[#allocation12] sm:$0xff]  }
 0xac0   : > { %3117 = vmatpush3.bf16.msra.mxu1 %v2016_v15  ;;  %v3405_v15 = vld [vmem:[#allocation12 + $0x8] sm:$0xff]  }
 0xac1   : > { %3118 = vmatprep.subr.bf16.mxu1 %v2018_v56 }
 0xac4   : > { %3119 = vmatpush3.bf16.msra.mxu1 %v2018_v56 }
 0xac5   : > { %v4898_v5 = vpop.eup %3520  ;;  %3120 = vmatprep.subr.bf16.mxu1 %v2020_v59 }
 0xac6   : > { %1961 = vadd.xlane.f32.xlu1 %v4898_v5 }
 0xac8   : > { %3121 = vmatpush3.bf16.msra.mxu1 %v2020_v59  ;;  %v3406_v59 = vld [vmem:[#allocation12 + $0x10] sm:$0xff]  }
 0xac9   : > { %v4901_v57 = vpop.eup %3522 }
 0xaca   : > { %1957 = vadd.xlane.f32.xlu1 %v4901_v57 }
 0xadb   : > { %2023 = vrot.lane.b32.xlu1 %v3571_v30, %s3903_s10  ;;  %v3409_v30 = vld [vmem:[#allocation12 + $0x28] sm:$0xff]  }
 0xadf   : > { %1426 = vrot.lane.b32.xlu1 %v1417_v9, %s3903_s10 }
 0xae3   : > { %1767 = vrot.lane.b32.xlu1 %v1758_v60, %s3902_s28 }
 0xae7   : > { %1430 = vrot.lane.b32.xlu1 %v1419_v38, %s3903_s10 }
 0xb1b   : > { %v1952_v40 = vpop.xlane.xlu1 %1951 }
 0xb1c   : > { %3524 = vrcp.f32 %v1952_v40  ;;  %v3410_v40 = vld [vmem:[#allocation12 + $0x30] sm:$0xff]  }
 0xb1f   : > { %v1948_v48 = vpop.xlane.xlu0 %1947 }
 0xb20   : > { %3526 = vrcp.f32 %v1948_v48  ;;  %v3411_v48 = vld [vmem:[#allocation12 + $0x38] sm:$0xff]  }
 0xb23   : > { %v1954_v10 = vpop.xlane.xlu1 %1953 }
 0xb24   : > { %3528 = vrcp.f32 %v1954_v10 }
 0xb26   : > { %v3525_v3 = vpop.eup %3524 }
 0xb27   : > { %v1973_v45 = vmul.f32 %v3525_v3, %v4864_v53  ;;  %v1956_v46 = vpop.xlane.xlu0 %1955  ;;  %v1950_v9 = vpop.xlane.xlu1 %1949 }
 0xb28   : > { %3530 = vrcp.f32 %v1956_v46 }
 0xb29   : > { %2761 = vst [vmem:[%s4557_s30 + $0xd0] sm:$0xff] %v1973_v45  ;;  %3532 = vrcp.f32 %v1950_v9  ;;  %v1999_v23 = vmul.f32 %v2769_v52, %v1973_v45 }
 0xb2a   : > { %v3527_v27 = vpop.eup %3526 }
 0xb2b   : > { %v2022_v32 = vpop.permute.xlu0 %2021  ;;  %v1960_v29 = vpop.xlane.xlu1 %1959  ;;  %v1971_v31 = vmul.f32 %v3527_v27, %v4867_v35 }
 0xb2c   : > { %3534 = vrcp.f32 %v1960_v29  ;;  %3122 = vmatprep.subr.bf16.mxu1 %v2022_v32 }
 0xb2d   : > { %2759 = vst [vmem:[%s4557_s30 + $0xc0] sm:$0xff] %v1971_v31  ;;  %3123 = vmatpush3.bf16.msra.mxu1 %v2022_v32  ;;  %v1997_v43 = vmul.f32 %v2767_v17, %v1971_v31 }
 0xb2e   : > { %v3529_v38 = vpop.eup %3528 }
 0xb2f   : > { %v1974_v60 = vmul.f32 %v3529_v38, %v4870_v39  ;;  %v1425_v11 = vpop.permute.xlu0 %1424  ;;  %v2771_v39 = vld [vmem:[%s4361_s16 + $0xe0] sm:$0xff] }
 0xb30   : > { %1437 = vst.msk [vmem:[#allocation2] sm:$0xff] %vm1436_vm1, %v1425_v11 }
 0xb31   : > { %2762 = vst [vmem:[%s4557_s30 + $0xd8] sm:$0xff] %v1974_v60  ;;  %v2000_v22 = vmul.f32 %v2770_v50, %v1974_v60 }
 0xb32   : > { %v3531_v12 = vpop.eup %3530 }
 0xb33   : > { %v3533_v13 = vpop.eup %3532  ;;  %v1766_v19 = vpop.permute.xlu0 %1765  ;;  %v1975_v28 = vmul.f32 %v3531_v12, %v4875_v58  ;;  %v2006_v55 = vpack.c.bf16 %v2000_v22, %v1999_v23  ;;  %v560_v22 = vld [vmem:[%s4344_s19 + $0x20] sm:$0xff] }
 0xb34   : > { %1778 = vst.msk [vmem:[#allocation2] sm:$0xff] %vm1777_vm2, %v1766_v19  ;;  %v1972_v42 = vmul.f32 %v3533_v13, %v4873_v4 }
 0xb35   : > { %2763 = vst [vmem:[%s4557_s30 + $0xe0] sm:$0xff] %v1975_v28  ;;  %v2001_v2 = vmul.f32 %v2771_v39, %v1975_v28  ;;  %v557_v28 = vld [vmem:[%s4344_s19 + $0x8] sm:$0xff] }
 0xb36   : > { %v3535_v24 = vpop.eup %3534  ;;  %2760 = vst [vmem:[%s4557_s30 + $0xc8] sm:$0xff] %v1972_v42  ;;  %v1998_v44 = vmul.f32 %v2768_v26, %v1972_v42  ;;  %v556_v26 = vld [vmem:[%s4344_s19] sm:$0xff] }
 0xb37   : > { %v1429_v18 = vpop.permute.xlu0 %1428  ;;  %v1977_v20 = vmul.f32 %v3535_v24, %v4879_v0  ;;  %v2773_v0 = vld [vmem:[%s4361_s16 + $0xf0] sm:$0xff]  ;;  %v564_v42 = vpack.c.bf16 %v557_v28, %v556_v26  ;;  %s5031_s16 = scalar_lea.hbm %s5249_s5, %s2789_s27 }
 0xb38   : > { %1439 = vst.msk [vmem:[#allocation2 + $0x10] sm:$0xff] %vm1436_vm1, %v1429_v18  ;;  %v2005_v21 = vpack.c.bf16 %v1998_v44, %v1997_v43  ;;  %v3572_v43 = vld [vmem:[%s4344_s19 + $0x10] sm:$0xff] }
 0xb39   : > { %2765 = vst [vmem:[%s4557_s30 + $0xf0] sm:$0xff] %v1977_v20  ;;  %v2003_v6 = vmul.f32 %v2773_v0, %v1977_v20  ;;  %2934 = vmatprep.mubr.bf16.mxu0 %v564_v42 }
 0xb3a   : > { %3126 = vmatprep.mubr.bf16.mxu1 %v2005_v21 }
 0xb53   : > { %v1962_v49 = vpop.xlane.xlu1 %1961 }
 0xb54   : > { %3536 = vrcp.f32 %v1962_v49 }
 0xb57   : > { %v1958_v51 = vpop.xlane.xlu1 %1957 }
 0xb58   : > { %3538 = vrcp.f32 %v1958_v51  ;;  %v3573_v51 = vld [vmem:[%s4344_s19 + $0x18] sm:$0xff] }
 0xb5b   : > { %v2024_v53 = vpop.permute.xlu1 %2023 }
 0xb5c   : > { %3124 = vmatprep.subr.bf16.mxu1 %v2024_v53 }
 0xb5d   : > { %3125 = vmatpush3.bf16.msra.mxu1 %v2024_v53 }
 0xb5e   : > { %v3537_v54 = vpop.eup %3536  ;;  %3134 = vmatprep.subr.bf16.mxu1 %v3404_v47 }
 0xb5f   : > { %v1427_v35 = vpop.permute.xlu1 %1426  ;;  %v1978_v33 = vmul.f32 %v3537_v54, %v4898_v5  ;;  %v3407_v5 = vld [vmem:[#allocation12 + $0x18] sm:$0xff]   ;;  %v561_v54 = vld [vmem:[%s4344_s19 + $0x28] sm:$0xff] }
 0xb60   : > { %1438 = vst.msk [vmem:[#allocation2 + $0x8] sm:$0xff] %vm1436_vm1, %v1427_v35  ;;  %3127 = vmatmul.mubr.bf16.vlgmr.msra.gmra.mrb[24].mxu1 %v2006_v55 }
 0xb61   : > { %2766 = vst [vmem:[%s4557_s30 + $0xf8] sm:$0xff] %v1978_v33  ;;  %v2004_v1 = vmul.f32 %v2774_v41, %v1978_v33  ;;  %3135 = vmatpush3.bf16.msra.mxu1 %v3404_v47 }
 0xb62   : > { %v3539_v34 = vpop.eup %3538  ;;  %3136 = vmatprep.subr.bf16.mxu1 %v3405_v15 }
 0xb63   : > { %v1768_v4 = vpop.permute.xlu1 %1767  ;;  %v1976_v58 = vmul.f32 %v3539_v34, %v4901_v57  ;;  %v2008_v56 = vpack.c.bf16 %v2004_v1, %v2003_v6  ;;  %v3408_v57 = vld [vmem:[#allocation12 + $0x20] sm:$0xff]   ;;  %v3574_v34 = vld [vmem:[%s4344_s19 + $0x30] sm:$0xff] }
 0xb64   : > { %1779 = vst.msk [vmem:[#allocation2 + $0x8] sm:$0xff] %vm1777_vm2, %v1768_v4 }
 0xb65   : > { %2764 = vst [vmem:[%s4557_s30 + $0xe8] sm:$0xff] %v1976_v58  ;;  %v2002_v37 = vmul.f32 %v2772_v25, %v1976_v58  ;;  %3137 = vmatpush3.bf16.msra.mxu1 %v3405_v15  ;;  %v3575_v25 = vld [vmem:[%s4344_s19 + $0x38] sm:$0xff] }
 0xb66   : > { %3138 = vmatprep.subr.bf16.mxu1 %v3406_v59 }
 0xb67   : > { %v1431_v7 = vpop.permute.xlu1 %1430  ;;  %v2007_v16 = vpack.c.bf16 %v2002_v37, %v2001_v2 }
 0xb68   : > { %1440 = vst.msk [vmem:[#allocation2 + $0x18] sm:$0xff] %vm1436_vm1, %v1431_v7 }
 0xb69   : > { %3130 = vmatprep.mubr.bf16.mxu1 %v2007_v16  ;;  %3139 = vmatpush3.bf16.msra.mxu1 %v3406_v59 }
 0xb6a   : > { %3131 = vmatmul.mubr.bf16.gmra.mrb[28].mxu1 %v2008_v56  ;;  %3140 = vmatprep.subr.bf16.mxu1 %v3407_v5 }
 0xb6d   : > { %3141 = vmatpush3.bf16.msra.mxu1 %v3407_v5 }
 0xb6e   : > { %3142 = vmatprep.subr.bf16.mxu1 %v3408_v57 }
 0xb71   : > { %3143 = vmatpush3.bf16.msra.mxu1 %v3408_v57 }
 0xb72   : > { %3144 = vmatprep.subr.bf16.mxu1 %v3409_v30 }
 0xb75   : > { %3145 = vmatpush3.bf16.msra.mxu1 %v3409_v30 }
 0xb76   : > { %3146 = vmatprep.subr.bf16.mxu1 %v3410_v40 }
 0xb79   : > { %3147 = vmatpush3.bf16.msra.mxu1 %v3410_v40 }
 0xb7a   : > { %3148 = vmatprep.subr.bf16.mxu1 %v3411_v48 }
 0xb7d   : > { %3149 = vmatpush3.bf16.msra.mxu1 %v3411_v48 }
 0xc33   : > { %v3128_v10 = vpop.f32.mrb[24].mxu1 }
 0xc34   : > { %v2067_v3 = vpop.f32.mrb[25].mxu1 }
 0xc35   : > { %v3129_v45 = vpop.f32.mrb[26].mxu1 }
 0xc36   : > { %v2099_v46 = vpack.c.bf16 %v3129_v45, %v3128_v10  ;;  %v2070_v9 = vpop.f32.mrb[27].mxu1 }
 0xc37   : > { %v2098_v27 = vpack.c.bf16 %v2070_v9, %v2067_v3 }
 0xc38   : > { %2108 = vrot.lane.b32.xlu1 %v2099_v46, %s3901_s14 }
 0xc39   : > { %2106 = vrot.lane.b32.xlu0 %v2098_v27, %s3901_s14 }
 0xc3c   : > { %1771 = vrot.lane.b32.xlu1 %v1760_v62, %s3902_s28 }
 0xc3d   : > { %1769 = vrot.lane.b32.xlu0 %v1759_v36, %s3902_s28  ;;  %v3132_v32 = vpop.f32.mrb[28].mxu1  ;;  %s3904_s28 = smov [#allocation14]  }
 0xc3e   : > { %v2083_v29 = vpop.f32.mrb[29].mxu1  ;;  %s3720_s10 = sshll.u32 %s3904_s28, 4  ;;  %s3721_s10 = int_to_ptr.vmem [resolvable:$false] %s3720_s10 }
 0xc3f   : > { %v3133_v31 = vpop.f32.mrb[30].mxu1  ;;  %s3722_s9 = scalar_lea.vmem %s3721_s10, 2048  ;;  %p3723_p10 = scmp.lt.s32.totalorder %s5034_s13, %s3721_s10 }
 0xc40   : > { %v2101_v38 = vpack.c.bf16 %v3133_v31, %v3132_v32  ;;  %v2086_v60 = vpop.f32.mrb[31].mxu1  ;;  %p3724_p4 = scmp.lt.s32.totalorder %s3722_s9, %s3716_s29 }
 0xc41   : > { %v2100_v11 = vpack.c.bf16 %v2086_v60, %v2083_v29 }
 0xc42   : > { %2112 = vrot.lane.b32.xlu1 %v2101_v38, %s3901_s14  ;;  %p3725_p13 = por %p3724_p4, %p3723_p10 }
 0xc43   : > { %2110 = vrot.lane.b32.xlu0 %v2100_v11, %s3901_s14  ;;  %s2384_s14 = scalar_lea.sflag [#allocation5], %s4338_s22 }
 0xc44   : > { %p3726_p6 = pnand %p3725_p13, %p3719_p2 }
 0xcaa   : > { %v2109_v12 = vpop.permute.xlu1 %2108 }
 0xcab   : > { %2120 = vst.msk [vmem:[#allocation2 + $0x8] sm:$0xff] %vm2118_vm3, %v2109_v12  ;;  %v2107_v8 = vpop.permute.xlu0 %2106 }
 0xcac   : > { %2119 = vst.msk [vmem:[#allocation2] sm:$0xff] %vm2118_vm3, %v2107_v8 }
 0xcae   : > { %v1772_v14 = vpop.permute.xlu1 %1771 }
 0xcaf   : > { %1781 = vst.msk [vmem:[#allocation2 + $0x18] sm:$0xff] %vm1777_vm2, %v1772_v14  ;;  %v1770_v61 = vpop.permute.xlu0 %1769 }
 0xcb0   : > { %1780 = vst.msk [vmem:[#allocation2 + $0x10] sm:$0xff] %vm1777_vm2, %v1770_v61  ;;  %v566_v61 = vpack.c.bf16 %v561_v54, %v560_v22 }
 0xcb2   : > { %v2124_v36 = vld [vmem:[#allocation2 + $0x8] sm:$0xff]  ;;  %2938 = vmatprep.mubr.bf16.mxu0 %v566_v61 }
 0xcb3   : > { %v2123_v62 = vld [vmem:[#allocation2] sm:$0xff] }
 0xcb4   : > { %3150 = vmatprep.mubr.bf16.mxu1 %v2123_v62  ;;  %v2113_v63 = vpop.permute.xlu1 %2112 }
 0xcb5   : > { %2122 = vst.msk [vmem:[#allocation2 + $0x18] sm:$0xff] %vm2118_vm3, %v2113_v63  ;;  %v2111_v13 = vpop.permute.xlu0 %2110  ;;  %3151 = vmatmul.mubr.bf16.vlgmr.msra.gmra.mrb[32].mxu1 %v2124_v36 }
 0xcb6   : > { %2121 = vst.msk [vmem:[#allocation2 + $0x10] sm:$0xff] %vm2118_vm3, %v2111_v13 }
 0xcbc   : > { %v2126_v17 = vld [vmem:[#allocation2 + $0x18] sm:$0xff] }
 0xcbd   : > { %v2125_v19 = vld [vmem:[#allocation2 + $0x10] sm:$0xff] }
 0xcbe   : > { %3154 = vmatprep.mubr.bf16.mxu1 %v2125_v19 }
 0xcbf   : > { %3155 = vmatmul.mubr.bf16.gmra.mrb[36].mxu1 %v2126_v17 }
 0xd88   : > { %v3152_v24 = vpop.f32.mrb[32].mxu1 }
 0xd89   : > { %v2234_v44 = vadd.f32 %v3572_v43, %v3152_v24  ;;  %v2225_v18 = vpop.f32.mrb[33].mxu1 }
 0xd8a   : > { %v3153_v20 = vpop.f32.mrb[34].mxu1  ;;  %v2226_v50 = vadd.f32 %v2225_v18, %v556_v26 }
 0xd8b   : > { %2260 = vadd.xlane.f32.xlu0 %v2234_v44  ;;  %v2228_v21 = vpop.f32.mrb[35].mxu1  ;;  %v2237_v52 = vadd.f32 %v3573_v51, %v3153_v20 }
 0xd8c   : > { %v2229_v49 = vadd.f32 %v2228_v21, %v557_v28  ;;  %v2783_v21 = vld [vmem:[%s5244_s7] ss:$0 sm:$0xff] }
 0xd8e   : > { %2258 = vadd.xlane.f32.xlu1 %v2229_v49 }
 0xd8f   : > { %2256 = vadd.xlane.f32.xlu0 %v2226_v50 }
 0xd92   : > { %v3156_v53 = vpop.f32.mrb[36].mxu1 }
 0xd93   : > { %2262 = vadd.xlane.f32.xlu0 %v2237_v52  ;;  %v2241_v23 = vpop.f32.mrb[37].mxu1  ;;  %v2250_v39 = vadd.f32 %v3574_v34, %v3156_v53  ;;  %v2784_v53 = vld [vmem:[%s5245_s8] ss:$0 sm:$0xff] }
 0xd94   : > { %v2242_v55 = vadd.f32 %v2241_v23, %v560_v22  ;;  %v3157_v35 = vpop.f32.mrb[38].mxu1 }
 0xd95   : > { %v2244_v33 = vpop.f32.mrb[39].mxu1  ;;  %v2253_v4 = vadd.f32 %v3575_v25, %v3157_v35 }
 0xd96   : > { %v2245_v41 = vadd.f32 %v2244_v33, %v561_v54 }
 0xd97   : > { %2264 = vadd.xlane.f32.xlu0 %v2242_v55 }
 0xd98   : > { %2266 = vadd.xlane.f32.xlu1 %v2245_v41 }
 0xd9b   : > { %2268 = vadd.xlane.f32.xlu0 %v2250_v39 }
 0xd9c   : > { %2270 = vadd.xlane.f32.xlu1 %v2253_v4 }
 0xe18   : > { %v2261_v58 = vpop.xlane.xlu0 %2260 }
 0xe19   : > { %v2275_v0 = vmul.f32 0.0078125, %v2261_v58 }
 0xe1b   : > { %v2283_v1 = vsub.f32 %v2234_v44, %v2275_v0  ;;  %v2259_v7 = vpop.xlane.xlu1 %2258 }
 0xe1c   : > { %v2257_v2 = vpop.xlane.xlu0 %2256  ;;  %v2274_v47 = vmul.f32 0.0078125, %v2259_v7 }
 0xe1d   : > { %v2273_v37 = vmul.f32 0.0078125, %v2257_v2  ;;  %v2291_v6 = vmul.f32 %v2283_v1, %v2283_v1 }
 0xe1e   : > { %v4980_v30 = vsub.f32 %v2229_v49, %v2274_v47 }
 0xe1f   : > { %v4974_v16 = vsub.f32 %v2226_v50, %v2273_v37  ;;  %2301 = vadd.xlane.f32.xlu0 %v2291_v6 }
 0xe20   : > { %v2263_v56 = vpop.xlane.xlu0 %2262  ;;  %v2290_v31 = vmul.f32 %v4980_v30, %v4980_v30 }
 0xe21   : > { %v2276_v15 = vmul.f32 0.0078125, %v2263_v56  ;;  %v2289_v59 = vmul.f32 %v4974_v16, %v4974_v16 }
 0xe23   : > { %v4978_v5 = vsub.f32 %v2237_v52, %v2276_v15  ;;  %2297 = vadd.xlane.f32.xlu0 %v2289_v59 }
 0xe24   : > { %v2265_v57 = vpop.xlane.xlu0 %2264 }
 0xe25   : > { %v2277_v40 = vmul.f32 0.0078125, %v2265_v57  ;;  %v2267_v48 = vpop.xlane.xlu1 %2266  ;;  %v2292_v10 = vmul.f32 %v4978_v5, %v4978_v5 }
 0xe26   : > { %v2278_v3 = vmul.f32 0.0078125, %v2267_v48 }
 0xe27   : > { %v4984_v45 = vsub.f32 %v2242_v55, %v2277_v40  ;;  %2303 = vadd.xlane.f32.xlu1 %v2292_v10 }
 0xe28   : > { %v2269_v46 = vpop.xlane.xlu0 %2268  ;;  %v4986_v9 = vsub.f32 %v2245_v41, %v2278_v3 }
 0xe29   : > { %v2279_v27 = vmul.f32 0.0078125, %v2269_v46  ;;  %v2271_v32 = vpop.xlane.xlu1 %2270  ;;  %v2293_v29 = vmul.f32 %v4984_v45, %v4984_v45 }
 0xe2a   : > { %v2280_v38 = vmul.f32 0.0078125, %v2271_v32  ;;  %v2294_v8 = vmul.f32 %v4986_v9, %v4986_v9 }
 0xe2b   : > { %v4992_v60 = vsub.f32 %v2250_v39, %v2279_v27  ;;  %2305 = vadd.xlane.f32.xlu0 %v2293_v29  ;;  %2299 = vadd.xlane.f32.xlu1 %v2290_v31 }
 0xe2c   : > { %v4994_v11 = vsub.f32 %v2253_v4, %v2280_v38 }
 0xe2d   : > { %v2295_v12 = vmul.f32 %v4992_v60, %v4992_v60 }
 0xe2e   : > { %v2296_v14 = vmul.f32 %v4994_v11, %v4994_v11 }
 0xe2f   : > { %2309 = vadd.xlane.f32.xlu0 %v2295_v12  ;;  %2307 = vadd.xlane.f32.xlu1 %v2294_v8 }
 0xe33   : > { %2311 = vadd.xlane.f32.xlu1 %v2296_v14 }
 0xeac   : > { %v2302_v62 = vpop.xlane.xlu0 %2301 }
 0xead   : > { %v2315_v63 = vmul.f32 0.0078125, %v2302_v62 }
 0xeaf   : > { %v2323_v36 = vadd.f32 1e-06, %v2315_v63 }
 0xeb0   : > { %v2298_v13 = vpop.xlane.xlu0 %2297 }
 0xeb1   : > { %3540 = vrsqrt.f32 %v2323_v36  ;;  %v2313_v19 = vmul.f32 0.0078125, %v2298_v13 }
 0xeb3   : > { %v2321_v17 = vadd.f32 1e-06, %v2313_v19 }
 0xeb4   : > { %v2304_v26 = vpop.xlane.xlu1 %2303 }
 0xeb5   : > { %3542 = vrsqrt.f32 %v2321_v17  ;;  %v2316_v28 = vmul.f32 0.0078125, %v2304_v26 }
 0xeb7   : > { %v2324_v42 = vadd.f32 1e-06, %v2316_v28 }
 0xeb8   : > { %v2306_v24 = vpop.xlane.xlu0 %2305  ;;  %v2300_v43 = vpop.xlane.xlu1 %2299 }
 0xeb9   : > { %3544 = vrsqrt.f32 %v2324_v42  ;;  %v2317_v44 = vmul.f32 0.0078125, %v2306_v24  ;;  %v2314_v18 = vmul.f32 0.0078125, %v2300_v43 }
 0xebb   : > { %v3541_v20 = vpop.eup %3540  ;;  %v2325_v49 = vadd.f32 1e-06, %v2317_v44  ;;  %v2322_v50 = vadd.f32 1e-06, %v2314_v18 }
 0xebc   : > { %v2339_v51 = vmul.f32 %v3541_v20, %v2283_v1  ;;  %v2310_v52 = vpop.xlane.xlu0 %2309  ;;  %v2308_v22 = vpop.xlane.xlu1 %2307 }
 0xebd   : > { %3546 = vrsqrt.f32 %v2325_v49  ;;  %v2319_v23 = vmul.f32 0.0078125, %v2310_v52  ;;  %v2318_v54 = vmul.f32 0.0078125, %v2308_v22 }
 0xebe   : > { %v2354_v55 = vmul.f32 %v2783_v21, %v2339_v51  ;;  %3548 = vrsqrt.f32 %v2322_v50 }
 0xebf   : > { %v3543_v35 = vpop.eup %3542  ;;  %v2327_v33 = vadd.f32 1e-06, %v2319_v23  ;;  %v2326_v41 = vadd.f32 1e-06, %v2318_v54 }
 0xec0   : > { %v2369_v34 = vadd.f32 %v2784_v53, %v2354_v55  ;;  %v2337_v39 = vmul.f32 %v3543_v35, %v4974_v16  ;;  %v2312_v25 = vpop.xlane.xlu1 %2311 }
 0xec1   : > { %3550 = vrsqrt.f32 %v2327_v33  ;;  %v2320_v4 = vmul.f32 0.0078125, %v2312_v25 }
 0xec2   : > { %2377 = vst [vmem:[%s5011_s15 + $0x10] sm:$0xff] %v2369_v34  ;;  %v2352_v58 = vmul.f32 %v2783_v21, %v2337_v39  ;;  %3552 = vrsqrt.f32 %v2326_v41 }
 0xec3   : > { %v3545_v0 = vpop.eup %3544  ;;  %v2328_v1 = vadd.f32 1e-06, %v2320_v4 }
 0xec4   : > { %v2367_v2 = vadd.f32 %v2784_v53, %v2352_v58  ;;  %v2340_v37 = vmul.f32 %v3545_v0, %v4978_v5 }
 0xec5   : > { %3554 = vrsqrt.f32 %v2328_v1 }
 0xec6   : > { %2375 = vst [vmem:[%s5011_s15] sm:$0xff] %v2367_v2  ;;  %v2355_v6 = vmul.f32 %v2783_v21, %v2340_v37 }
 0xec7   : > { %v3547_v7 = vpop.eup %3546 }
 0xec8   : > { %v3549_v16 = vpop.eup %3548  ;;  %v2370_v56 = vadd.f32 %v2784_v53, %v2355_v6  ;;  %v2341_v47 = vmul.f32 %v3547_v7, %v4984_v45 }
 0xec9   : > { %v2338_v15 = vmul.f32 %v3549_v16, %v4980_v30 }
 0xeca   : > { %2378 = vst [vmem:[%s5011_s15 + $0x18] sm:$0xff] %v2370_v56  ;;  %v2356_v59 = vmul.f32 %v2783_v21, %v2341_v47 }
 0xecb   : > { %v3551_v57 = vpop.eup %3550  ;;  %v2353_v40 = vmul.f32 %v2783_v21, %v2338_v15 }
 0xecc   : > { %v3553_v5 = vpop.eup %3552  ;;  %v2371_v48 = vadd.f32 %v2784_v53, %v2356_v59  ;;  %v2343_v10 = vmul.f32 %v3551_v57, %v4992_v60 }
 0xecd   : > { %v2368_v3 = vadd.f32 %v2784_v53, %v2353_v40  ;;  %v2342_v46 = vmul.f32 %v3553_v5, %v4986_v9 }
 0xece   : > { %2379 = vst [vmem:[%s5011_s15 + $0x20] sm:$0xff] %v2371_v48  ;;  %v2358_v45 = vmul.f32 %v2783_v21, %v2343_v10 }
 0xecf   : > { %v3555_v30 = vpop.eup %3554  ;;  %2376 = vst [vmem:[%s5011_s15 + $0x8] sm:$0xff] %v2368_v3  ;;  %v2357_v27 = vmul.f32 %v2783_v21, %v2342_v46 }
 0xed0   : > { %v2373_v32 = vadd.f32 %v2784_v53, %v2358_v45  ;;  %v2344_v29 = vmul.f32 %v3555_v30, %v4994_v11 }
 0xed1   : > { %v2372_v31 = vadd.f32 %v2784_v53, %v2357_v27 }
 0xed2   : > { %2381 = vst [vmem:[%s5011_s15 + $0x30] sm:$0xff] %v2373_v32  ;;  %v2359_v38 = vmul.f32 %v2783_v21, %v2344_v29 }
 0xed3   : > { %2380 = vst [vmem:[%s5011_s15 + $0x28] sm:$0xff] %v2372_v31 }
 0xed4   : > { %v2374_v9 = vadd.f32 %v2784_v53, %v2359_v38 }
 0xed6   : > { %2382 = vst [vmem:[%s5011_s15 + $0x38] sm:$0xff] %v2374_v9 }
 0xed7   : > { %3729 = shalt.err (!%p3726_p6)
}
 0xed8   : > { %s3730_s19 = scalar_lea.hbm %s5031_s16, 1024  ;;  %s3734_s26 = scalar_lea.hbm %s5249_s5, 4096 }
 0xed9   : > { %p3731_p5 = scmp.ne.s32.totalorder %s5031_s16, %s3730_s19  ;;  %p3735_p7 = scmp.lt.u32.totalorder %s5031_s16, %s5249_s5 }
 0xeda   : > { %p3736_p8 = scmp.lt.u32.totalorder %s3734_s26, %s3730_s19  ;;  %p3738_p1 = scmp.lt.u32.totalorder %s3730_s19, %s5031_s16 }
 0xedb   : > { %p3732_p3 = pnand %p3731_p5, %p5250_p11 }
 0xedc   : > { %p3737_p9 = por %p3736_p8, %p3735_p7 }
 0xedd   : > { %p3733_p12 = pneg %p3732_p3 }
 0xede   : > { %p3739_p0 = por %p3738_p1, %p3737_p9 }
 0xee0   : > { %p3740_p2 = pnand %p3739_p0, %p3733_p12 }
 0xee2   : > { %3743 = shalt.err (!%p3740_p2)
}
 0xee3   : > { %s3905_s25 = smov 128   ;;  %s3906_s23 = smov 256  }
 0xee4   : > { %s3907_s27 = smov 8   ;;  %s2389_s1 = scalar_lea.sflag [#allocation16], %s4338_s22 }
 0xee5   : > { %3213 = dma.vmem_to_hbm [thread:$0]  (%p5250_p11), %s5034_s13, 1024, %s5031_s16, %s2384_s14, %s3905_s25, %s3906_s23, %s3907_s27  }
 0xee6   : > { %s2790_s4 = sshll.u32 %s5246_s18, 3  ;;  %s2791_s29 = sshll.u32 %s5247_s12, 6 }
 0xee7   : > { %s2419_s28 = sadd.s32 %s2791_s29, %s2790_s4  ;;  %s2438_s10 = sshll.u32 %s4557_s30, 4  ;;  %s2439_s10 = int_to_ptr.vmem [resolvable:$true] %s2438_s10 }
 0xee8   : > { %s2792_s9 = sshll.u32 %s2419_s28, 7  ;;  %s5251_s13 = sld [smem:[#allocation55_spill]] }
 0xee9   : > { %s3908_s16 = smov 1024   ;;  %s3909_s14 = smov 2048  }
 0xeea   : > { %3214 = sst [smem:[#allocation20]] (%p5250_p11), %s3908_s16  ;;  %s3910_s24 = smov 8  }
 0xeeb   : > { %3215 = sst [smem:[#allocation20 + $0x1]] (%p5250_p11), %s3909_s14  ;;  %s3911_s18 = smov 128  }
 0xeec   : > { %3216 = sst [smem:[#allocation20 + $0x2]] (%p5250_p11), %s3910_s24  ;;  %s3912_s30 = smov [#allocation19]  }
 0xeed   : > { %3217 = sst [smem:[#allocation20 + $0x3]] (%p5250_p11), %s3911_s18  ;;  %s3913_s12 = smov 0  }
 0xeee   : > { %s2421_s22 = scalar_lea.hbm %s5251_s13, %s2792_s9  ;;  %3218 = sst [smem:[#allocation20 + $0x4]] (%p5250_p11), %s3911_s18 }
 0xeef   : > { %3219 = sst [smem:[#allocation20 + $0x5]] (%p5250_p11), %s3910_s24 }
 0xef0   : > { %3220 = dma.general (%p5250_p11), %s2439_s10, 4096, %s2421_s22, %s2389_s1, %s3912_s30, [#allocation20], %s3913_s12, 0  }
 0xef1 PF: > { %s5252_s26 = sld [smem:[#allocation36_spill]]  ;;  %s5253_s8 = sld [smem:[#allocation32_spill]] }
 0xef2   : > { %s5254_s15 = sld [smem:[#allocation47_spill]] }
 0xef7   : > { %p3241_p10 = scmp.ge.s32.totalorder %s5252_s26, 2  ;;  %s2466_s25 = sand.u32 1, %s5253_s8  }
 0xef8   : > { %p5255_p4 = scmp.ne.s32.totalorder %s5254_s15, 0  ;;  %s2467_s23 = scalar_lea.sflag [#allocation5], %s2466_s25 }
 0xefa   : > { %p3231_p13 = pnand %p3241_p10, %p5255_p4 }
 0xefc   : > { %3821 = dma.done.wait (!%p3231_p13), %s2467_s23, 1024  }
 0xefd   : > { %3823 = vsyncadd (!%p3231_p13), %s2467_s23, 4294966272  ;;  %s2476_s27 = scalar_lea.sflag [#allocation16], %s2466_s25 }
 0xefe   : > { %3825 = dma.done.wait (!%p3231_p13), %s2476_s27, 4096  }
 0xeff   : > { %3827 = vsyncadd (!%p3231_p13), %s2476_s27, 4294963200  ;;  %s36_s22 = sadd.s32 1, %s5252_s26   ;;  %s5257_s30 = sld [smem:[#allocation29_spill]] }
 0xf00   : > { %p5087_p6 = scmp.ge.s32.totalorder %s36_s22, 6   ;;  %s5258_s6 = sld [smem:[#allocation44_spill]] }
 0xf01   : > { %s5259_s12 = sld [smem:[#allocation30_spill]]  ;;  %s5260_s13 = sld [smem:[#allocation31_spill]] }
 0xf02   : > { %s5261_s14 = sld [smem:[#allocation41_spill]]  ;;  %s5262_s15 = sld [smem:[#allocation33_spill]] }
 0xf03   : > { %s5263_s1 = sld [smem:[#allocation42_spill]]  ;;  %s5264_s29 = sld [smem:[#allocation38_spill]] }
 0xf04   : > { %s5265_s28 = sld [smem:[#allocation39_spill]]  ;;  %s5266_s10 = smov %s3838_s11 }
 0xf05   : > { %s5268_s16 = smov %s3862_s17  ;;  %s5270_s18 = smov %s3874_s20 }
 0xf06   : > { %s5267_s11 = smov %s5258_s6  ;;  %s5271_s19 = smov %s3878_s21 }
 0xf07   :  { %35 = sbr.rel (!%p5087_p6) target bundleno = 25 (0x19), region = 175 }
 0xf09   : > { %s5269_s17 = smov %s5263_s1  ;;  %s5272_s20 = smov %s5264_s29 }
 0xf0a   : > { %s5273_s21 = smov %s5265_s28 }
 0xf0e   :  { %2481 = vsyncpa [#allocation4], 1 }
 0xf0f   :  { %2483 = vsyncpa [#allocation4 + $0x1], 1 }
 0xf10   :  { %2484 = vsyncpa [#allocation7], 1 }
 0xf11   :  { %2486 = vsyncpa [#allocation7 + $0x1], 1 }
 0xf12   :  { %2487 = vsyncpa [#allocation10], 1 }
 0xf13   :  { %2489 = vsyncpa [#allocation10 + $0x1], 1 }
 0xf14   :  { %2490 = vsyncpa [#allocation13], 1 }
 0xf15   :  { %2491 = vsyncpa [#allocation5], 1 }
 0xf16   :  { %2493 = vsyncpa [#allocation5 + $0x1], 1 }
 0xf17   :  { %2494 = vsyncpa [#allocation16], 1 }
 0xf18   :  { %2496 = vsyncpa [#allocation16 + $0x1], 1 }

</bundles_post_ra>
